<compile_context>
chip_gen: v5e
topology: v5e:2x2
jax: 0.10.0
libtpu: 0.0.40
codegen_flags: <defaults>
</compile_context>

<pallas_src>
import jax
import jax.numpy as jnp
from jax.experimental import pallas as pl
from jax.experimental.pallas import tpu as pltpu

_SELU_SCALE = 1.0507009873554805
_SELU_ALPHA = 1.6732632423543772


def _selu(v):
    # exp(min(v, 0)) avoids overflow in the unselected branch of the where.
    return _SELU_SCALE * jnp.where(
        v > 0, v, _SELU_ALPHA * (jnp.exp(jnp.minimum(v, 0.0)) - 1.0))


def _make_kernel(bb, l1, l2, l3, k2, k3):
    """Kernel closure over the static per-block sizes."""

    def kernel(p1_ref, w1_ref, b1_ref, w2_ref, s1_ref, t1_ref,
               w3_ref, s2_ref, t2_ref, out_ref, h1pad_ref, h2pad_ref):
        # Zero the padded scratches once per step; the pad rows (row 0 and the last
        # row) are never written afterwards, so the conv edge taps read zeros.
        h1pad_ref[...] = jnp.zeros_like(h1pad_ref)
        h2pad_ref[...] = jnp.zeros_like(h2pad_ref)

        # ---- conv1 + bias + SELU: one wide-contraction matmul for the whole batch
        #      block: (bb*L1, K1*Cin) @ (K1*Cin, 64), f32 MXU accumulation.
        h1 = _selu(jnp.dot(p1_ref[...], w1_ref[...],
                           preferred_element_type=jnp.float32) + b1_ref[...])

        for s in range(bb):  # static unroll over the samples of this block
            # sample s rows of h1 -> interior of the zero-padded (L1+2, 64) scratch
            h1pad_ref[1:l1 + 1, :] = h1[s * l1:(s + 1) * l1, :]

            # ---- conv2 + folded BN1 + SELU: full-im2col matmul, contraction K2*64.
            cols2 = jnp.concatenate(
                [h1pad_ref[k:k + l2, :] for k in range(k2)], axis=1)
            h2 = _selu(jnp.dot(cols2, w2_ref[...],
                               preferred_element_type=jnp.float32)
                       * s1_ref[...] + t1_ref[...])

            h2pad_ref[1:l2 + 1, :] = h2

            # ---- conv3 + folded BN2 + SELU: full-im2col matmul, contraction K3*32.
            cols3 = jnp.concatenate(
                [h2pad_ref[k:k + l3, :] for k in range(k3)], axis=1)
            h3 = _selu(jnp.dot(cols3, w3_ref[...],
                               preferred_element_type=jnp.float32)
                       * s2_ref[...] + t2_ref[...])

            # channels-last store; channel-major flatten happens in the wrapper.
            out_ref[s, :, :] = h3.astype(out_ref.dtype)

    return kernel


def cnn_forward(x, params, eps=1e-5):
    """Pallas forward of CNN: conv1+selu, conv2+BN1+selu, conv3+BN2+selu, flatten.

    x: (B, Cin, L) float32 -> (B, 32 * L3) float32.
    """
    B, c_in, L = x.shape
    w1, b1 = params["w1"], params["b1"]          # (64, Cin, 100), (64,)
    w2, b2 = params["w2"], params["b2"]          # (32, 64, 10),  (32,)
    w3, b3 = params["w3"], params["b3"]          # (32, 32, 5),   (32,)

    k1, k2, k3 = w1.shape[2], w2.shape[2], w3.shape[2]
    c1, c2, c3 = w1.shape[0], w2.shape[0], w3.shape[0]
    l1 = L - k1 + 1                # conv1: no padding
    l2 = l1 + 2 - k2 + 1           # conv2: padding=1
    l3 = l2 + 2 - k3 + 1           # conv3: padding=1

    # Batch block: whole batch in one grid step when small, otherwise blocks of 8
    # (8*L1 rows keeps the block sublane-aligned and fills the MXU M dimension).
    bb = B if (B <= 8 or B % 8 != 0) else 8
    n_blocks = B // bb

    # Fold BatchNorm (+ preceding conv bias) into one per-channel scale/shift.
    s1 = params["gamma1"] / jnp.sqrt(params["var1"] + eps)
    t1 = (b2 - params["mean1"]) * s1 + params["beta1"]
    s2 = params["gamma2"] / jnp.sqrt(params["var2"] + eps)
    t2 = (b3 - params["mean2"]) * s2 + params["beta2"]

    # conv1 im2col patches (wrapper-side layout plumbing, built once by XLA):
    # p1[b*L1 + i, k*Cin + ci] = x[b, ci, i + k]
    xf = x.astype(jnp.float32)
    idx = jnp.arange(l1)[:, None] + jnp.arange(k1)[None, :]        # (L1, K1)
    p1 = jnp.transpose(xf[:, :, idx], (0, 2, 3, 1)).reshape(B * l1, k1 * c_in)

    # Weights flattened to im2col form (K*Cin, Cout) with (k, ci) ordering.
    w1m = jnp.transpose(w1, (2, 1, 0)).reshape(k1 * c_in, c1).astype(jnp.float32)
    w2m = jnp.transpose(w2, (2, 1, 0)).reshape(k2 * c1, c2).astype(jnp.float32)
    w3m = jnp.transpose(w3, (2, 1, 0)).reshape(k3 * c2, c3).astype(jnp.float32)

    row = lambda v: v.reshape(1, -1).astype(jnp.float32)

    kernel = _make_kernel(bb, l1, l2, l3, k2, k3)

    out = pl.pallas_call(
        kernel,
        grid=(n_blocks,),
        in_specs=[
            pl.BlockSpec((bb * l1, k1 * c_in), lambda b: (b, 0)),   # conv1 patches
            pl.BlockSpec((k1 * c_in, c1), lambda b: (0, 0)),        # W1 (400, 64)
            pl.BlockSpec((1, c1), lambda b: (0, 0)),                # b1
            pl.BlockSpec((k2 * c1, c2), lambda b: (0, 0)),          # W2 (640, 32)
            pl.BlockSpec((1, c2), lambda b: (0, 0)),                # BN1 scale
            pl.BlockSpec((1, c2), lambda b: (0, 0)),                # BN1 shift
            pl.BlockSpec((k3 * c2, c3), lambda b: (0, 0)),          # W3 (160, 32)
            pl.BlockSpec((1, c3), lambda b: (0, 0)),                # BN2 scale
            pl.BlockSpec((1, c3), lambda b: (0, 0)),                # BN2 shift
        ],
        out_specs=pl.BlockSpec((bb, l3, c3), lambda b: (b, 0, 0)),
        out_shape=jax.ShapeDtypeStruct((B, l3, c3), jnp.float32),
        scratch_shapes=[pltpu.VMEM((l1 + 2, c1), jnp.float32),
                        pltpu.VMEM((l2 + 2, c2), jnp.float32)],
        compiler_params=pltpu.CompilerParams(
            dimension_semantics=("parallel",)),
    )(p1, w1m, row(b1), w2m, row(s1), row(t1), w3m, row(s2), row(t2))

    # (B, L3, C3) channels-last -> PyTorch (B, C3*L3) channel-major flatten.
    return jnp.transpose(out, (0, 2, 1)).reshape(B, c3 * l3)


def cnn_forward_ref(x, params, eps=1e-5):
    """Pure-JAX reference matching the PyTorch module semantics (inference BN)."""
    def conv1d(h, w, b, pad):
        y = jax.lax.conv_general_dilated(
            h, w, window_strides=(1,), padding=[(pad, pad)],
            dimension_numbers=("NCH", "OIH", "NCH"),
            precision=jax.lax.Precision.HIGHEST)
        return y + b[None, :, None]

    def bn(h, gamma, beta, mean, var):
        inv = gamma / jnp.sqrt(var + eps)
        return (h - mean[None, :, None]) * inv[None, :, None] + beta[None, :, None]

    h = jax.nn.selu(conv1d(x, params["w1"], params["b1"], 0))
    h = conv1d(h, params["w2"], params["b2"], 1)
    h = jax.nn.selu(bn(h, params["gamma1"], params["beta1"],
                       params["mean1"], params["var1"]))
    h = conv1d(h, params["w3"], params["b3"], 1)
    h = jax.nn.selu(bn(h, params["gamma2"], params["beta2"],
                       params["mean2"], params["var2"]))
    return h.reshape(h.shape[0], -1)


def init_params(key, input_size):
    ks = jax.random.split(key, 14)

    def conv(kw, kb, cout, cin, ksz):
        bound = 1.0 / float(cin * ksz) ** 0.5
        w = jax.random.uniform(kw, (cout, cin, ksz), jnp.float32, -bound, bound)
        b = jax.random.uniform(kb, (cout,), jnp.float32, -bound, bound)
        return w, b

    w1, b1 = conv(ks[0], ks[1], 64, input_size, 100)
    w2, b2 = conv(ks[2], ks[3], 32, 64, 10)
    w3, b3 = conv(ks[4], ks[5], 32, 32, 5)
    return dict(
        w1=w1, b1=b1, w2=w2, b2=b2, w3=w3, b3=b3,
        gamma1=1.0 + 0.1 * jax.random.normal(ks[6], (32,), jnp.float32),
        beta1=0.1 * jax.random.normal(ks[7], (32,), jnp.float32),
        mean1=0.1 * jax.random.normal(ks[8], (32,), jnp.float32),
        var1=1.0 + 0.2 * jax.random.uniform(ks[9], (32,), jnp.float32),
        gamma2=1.0 + 0.1 * jax.random.normal(ks[10], (32,), jnp.float32),
        beta2=0.1 * jax.random.normal(ks[11], (32,), jnp.float32),
        mean2=0.1 * jax.random.normal(ks[12], (32,), jnp.float32),
        var2=1.0 + 0.2 * jax.random.uniform(ks[13], (32,), jnp.float32),
    )


if __name__ == "__main__":
    batch, input_size, seq_len = 2, 4, 128   # L1=29, L2=22, L3=20 -> out (2, 640)
    key = jax.random.PRNGKey(0)
    k_par, k_x = jax.random.split(key)
    params = init_params(k_par, input_size)
    x = jax.random.normal(k_x, (batch, input_size, seq_len), dtype=jnp.float32)

    out = jax.block_until_ready(jax.jit(cnn_forward)(x, params))
    ref = jax.block_until_ready(cnn_forward_ref(x, params))

    assert out.shape == ref.shape == (batch, 32 * 20), (out.shape, ref.shape)
    assert bool(jnp.all(jnp.isfinite(out))), "non-finite output"
    assert jnp.allclose(out, ref, rtol=1e-3, atol=2e-4), \
        float(jnp.max(jnp.abs(out - ref)))
    print("KERNEL_OK")
</pallas_src>

<mosaic_0001>
module attributes {stable_mosaic.version = 11 : i64} {
  func.func @kernel(%arg0: i32, %arg1: memref<58x400xf32, #tpu.memory_space<vmem>>, %arg2: memref<400x64xf32, #tpu.memory_space<vmem>>, %arg3: memref<1x64xf32, #tpu.memory_space<vmem>>, %arg4: memref<640x32xf32, #tpu.memory_space<vmem>>, %arg5: memref<1x32xf32, #tpu.memory_space<vmem>>, %arg6: memref<1x32xf32, #tpu.memory_space<vmem>>, %arg7: memref<160x32xf32, #tpu.memory_space<vmem>>, %arg8: memref<1x32xf32, #tpu.memory_space<vmem>>, %arg9: memref<1x32xf32, #tpu.memory_space<vmem>>, %arg10: memref<2x20x32xf32, #tpu.memory_space<vmem>>, %arg11: memref<31x64xf32, #tpu.memory_space<vmem>>, %arg12: memref<24x32xf32, #tpu.memory_space<vmem>>) attributes {dimension_semantics = [#tpu.dimension_semantics<parallel>], iteration_bounds = array<i64: 1>, scalar_prefetch = 0 : i64, scratch_operands = 2 : i64, tpu.core_type = #tpu.core_type<tc>, window_params = [{transform_indices = @transform_0, window_bounds = array<i64: 58, 400>}, {pipeline_mode = #tpu.pipeline_mode<synchronous>, transform_indices = @transform_1, window_bounds = array<i64: 400, 64>}, {pipeline_mode = #tpu.pipeline_mode<synchronous>, transform_indices = @transform_2, window_bounds = array<i64: 1, 64>}, {pipeline_mode = #tpu.pipeline_mode<synchronous>, transform_indices = @transform_3, window_bounds = array<i64: 640, 32>}, {pipeline_mode = #tpu.pipeline_mode<synchronous>, transform_indices = @transform_4, window_bounds = array<i64: 1, 32>}, {pipeline_mode = #tpu.pipeline_mode<synchronous>, transform_indices = @transform_5, window_bounds = array<i64: 1, 32>}, {pipeline_mode = #tpu.pipeline_mode<synchronous>, transform_indices = @transform_6, window_bounds = array<i64: 160, 32>}, {pipeline_mode = #tpu.pipeline_mode<synchronous>, transform_indices = @transform_7, window_bounds = array<i64: 1, 32>}, {pipeline_mode = #tpu.pipeline_mode<synchronous>, transform_indices = @transform_8, window_bounds = array<i64: 1, 32>}, {transform_indices = @transform_9, window_bounds = array<i64: 2, 20, 32>}]} {
    %cst = arith.constant 0.000000e+00 : f32
    %0 = vector.broadcast %cst : f32 to vector<31x64xf32>
    %c0 = arith.constant 0 : index
    %c0_0 = arith.constant 0 : index
    %1 = vector.load %arg11[%c0, %c0_0] : memref<31x64xf32, #tpu.memory_space<vmem>>, vector<31x64xf32>
    tpu.vector_store %arg11[%c0, %c0_0], %0 {strides = array<i32>} : memref<31x64xf32, #tpu.memory_space<vmem>>, vector<31x64xf32>,
    %cst_1 = arith.constant 0.000000e+00 : f32
    %2 = vector.broadcast %cst_1 : f32 to vector<24x32xf32>
    %c0_2 = arith.constant 0 : index
    %c0_3 = arith.constant 0 : index
    %3 = vector.load %arg12[%c0_2, %c0_3] : memref<24x32xf32, #tpu.memory_space<vmem>>, vector<24x32xf32>
    tpu.vector_store %arg12[%c0_2, %c0_3], %2 {strides = array<i32>} : memref<24x32xf32, #tpu.memory_space<vmem>>, vector<24x32xf32>,
    %c0_4 = arith.constant 0 : index
    %c0_5 = arith.constant 0 : index
    %4 = vector.load %arg1[%c0_4, %c0_5] : memref<58x400xf32, #tpu.memory_space<vmem>>, vector<58x400xf32>
    %c0_6 = arith.constant 0 : index
    %c0_7 = arith.constant 0 : index
    %5 = vector.load %arg2[%c0_6, %c0_7] : memref<400x64xf32, #tpu.memory_space<vmem>>, vector<400x64xf32>
    %cst_8 = arith.constant dense<0.000000e+00> : vector<58x64xf32>
    %6 = tpu.matmul %4, %5, %cst_8 {dimension_numbers = #tpu.dot_dimension_numbers<[1], [0], [0], [1], [0, 0, 1, 1], [], []>} : vector<58x400xf32>, vector<400x64xf32>, vector<58x64xf32> -> vector<58x64xf32>
    %c0_9 = arith.constant 0 : index
    %c0_10 = arith.constant 0 : index
    %7 = vector.load %arg3[%c0_9, %c0_10] : memref<1x64xf32, #tpu.memory_space<vmem>>, vector<1x64xf32>
    %8 = vector.broadcast %7 : vector<1x64xf32> to vector<58x64xf32>
    %9 = arith.addf %6, %8 : vector<58x64xf32>
    %cst_11 = arith.constant 0.000000e+00 : f32
    %10 = vector.broadcast %cst_11 : f32 to vector<58x64xf32>
    %11 = arith.cmpf ogt, %9, %10 : vector<58x64xf32>
    %cst_12 = arith.constant 0.000000e+00 : f32
    %12 = vector.broadcast %cst_12 : f32 to vector<58x64xf32>
    %13 = arith.minimumf %9, %12 : vector<58x64xf32>
    %14 = math.exp %13 : vector<58x64xf32>
    %cst_13 = arith.constant 1.000000e+00 : f32
    %15 = vector.broadcast %cst_13 : f32 to vector<58x64xf32>
    %16 = arith.subf %14, %15 : vector<58x64xf32>
    %cst_14 = arith.constant 1.67326319 : f32
    %17 = vector.broadcast %cst_14 : f32 to vector<58x64xf32>
    %18 = arith.mulf %17, %16 : vector<58x64xf32>
    %19 = arith.select %11, %9, %18 : vector<58x64xi1>, vector<58x64xf32>
    %cst_15 = arith.constant 1.05070102 : f32
    %20 = vector.broadcast %cst_15 : f32 to vector<58x64xf32>
    %21 = arith.mulf %20, %19 : vector<58x64xf32>
    %22 = vector.extract_strided_slice %21 {offsets = [0, 0], sizes = [29, 64], strides = [1, 1]} : vector<58x64xf32> to vector<29x64xf32>
    %c1 = arith.constant 1 : index
    %c0_16 = arith.constant 0 : index
    %23 = vector.load %arg11[%c1, %c0_16] : memref<31x64xf32, #tpu.memory_space<vmem>>, vector<29x64xf32>
    tpu.vector_store %arg11[%c1, %c0_16], %22 {strides = array<i32>} : memref<31x64xf32, #tpu.memory_space<vmem>>, vector<29x64xf32>,
    %c0_17 = arith.constant 0 : index
    %c0_18 = arith.constant 0 : index
    %24 = vector.load %arg11[%c0_17, %c0_18] : memref<31x64xf32, #tpu.memory_space<vmem>>, vector<22x64xf32>
    %c1_19 = arith.constant 1 : index
    %c0_20 = arith.constant 0 : index
    %25 = vector.load %arg11[%c1_19, %c0_20] : memref<31x64xf32, #tpu.memory_space<vmem>>, vector<22x64xf32>
    %c2 = arith.constant 2 : index
    %c0_21 = arith.constant 0 : index
    %26 = vector.load %arg11[%c2, %c0_21] : memref<31x64xf32, #tpu.memory_space<vmem>>, vector<22x64xf32>
    %c3 = arith.constant 3 : index
    %c0_22 = arith.constant 0 : index
    %27 = vector.load %arg11[%c3, %c0_22] : memref<31x64xf32, #tpu.memory_space<vmem>>, vector<22x64xf32>
    %c4 = arith.constant 4 : index
    %c0_23 = arith.constant 0 : index
    %28 = vector.load %arg11[%c4, %c0_23] : memref<31x64xf32, #tpu.memory_space<vmem>>, vector<22x64xf32>
    %c5 = arith.constant 5 : index
    %c0_24 = arith.constant 0 : index
    %29 = vector.load %arg11[%c5, %c0_24] : memref<31x64xf32, #tpu.memory_space<vmem>>, vector<22x64xf32>
    %c6 = arith.constant 6 : index
    %c0_25 = arith.constant 0 : index
    %30 = vector.load %arg11[%c6, %c0_25] : memref<31x64xf32, #tpu.memory_space<vmem>>, vector<22x64xf32>
    %c7 = arith.constant 7 : index
    %c0_26 = arith.constant 0 : index
    %31 = vector.load %arg11[%c7, %c0_26] : memref<31x64xf32, #tpu.memory_space<vmem>>, vector<22x64xf32>
    %c8 = arith.constant 8 : index
    %c0_27 = arith.constant 0 : index
    %32 = vector.load %arg11[%c8, %c0_27] : memref<31x64xf32, #tpu.memory_space<vmem>>, vector<22x64xf32>
    %c9 = arith.constant 9 : index
    %c0_28 = arith.constant 0 : index
    %33 = vector.load %arg11[%c9, %c0_28] : memref<31x64xf32, #tpu.memory_space<vmem>>, vector<22x64xf32>
    %34 = tpu.concatenate %24, %25, %26, %27, %28, %29, %30, %31, %32, %33 in 1 : vector<22x64xf32>, vector<22x64xf32>, vector<22x64xf32>, vector<22x64xf32>, vector<22x64xf32>, vector<22x64xf32>, vector<22x64xf32>, vector<22x64xf32>, vector<22x64xf32>, vector<22x64xf32> -> vector<22x640xf32>
    %c0_29 = arith.constant 0 : index
    %c0_30 = arith.constant 0 : index
    %35 = vector.load %arg4[%c0_29, %c0_30] : memref<640x32xf32, #tpu.memory_space<vmem>>, vector<640x32xf32>
    %cst_31 = arith.constant dense<0.000000e+00> : vector<22x32xf32>
    %36 = tpu.matmul %34, %35, %cst_31 {dimension_numbers = #tpu.dot_dimension_numbers<[1], [0], [0], [1], [0, 0, 1, 1], [], []>} : vector<22x640xf32>, vector<640x32xf32>, vector<22x32xf32> -> vector<22x32xf32>
    %c0_32 = arith.constant 0 : index
    %c0_33 = arith.constant 0 : index
    %37 = vector.load %arg5[%c0_32, %c0_33] : memref<1x32xf32, #tpu.memory_space<vmem>>, vector<1x32xf32>
    %38 = vector.broadcast %37 : vector<1x32xf32> to vector<22x32xf32>
    %39 = arith.mulf %36, %38 : vector<22x32xf32>
    %c0_34 = arith.constant 0 : index
    %c0_35 = arith.constant 0 : index
    %40 = vector.load %arg6[%c0_34, %c0_35] : memref<1x32xf32, #tpu.memory_space<vmem>>, vector<1x32xf32>
    %41 = vector.broadcast %40 : vector<1x32xf32> to vector<22x32xf32>
    %42 = arith.addf %39, %41 : vector<22x32xf32>
    %cst_36 = arith.constant 0.000000e+00 : f32
    %43 = vector.broadcast %cst_36 : f32 to vector<22x32xf32>
    %44 = arith.cmpf ogt, %42, %43 : vector<22x32xf32>
    %cst_37 = arith.constant 0.000000e+00 : f32
    %45 = vector.broadcast %cst_37 : f32 to vector<22x32xf32>
    %46 = arith.minimumf %42, %45 : vector<22x32xf32>
    %47 = math.exp %46 : vector<22x32xf32>
    %cst_38 = arith.constant 1.000000e+00 : f32
    %48 = vector.broadcast %cst_38 : f32 to vector<22x32xf32>
    %49 = arith.subf %47, %48 : vector<22x32xf32>
    %cst_39 = arith.constant 1.67326319 : f32
    %50 = vector.broadcast %cst_39 : f32 to vector<22x32xf32>
    %51 = arith.mulf %50, %49 : vector<22x32xf32>
    %52 = arith.select %44, %42, %51 : vector<22x32xi1>, vector<22x32xf32>
    %cst_40 = arith.constant 1.05070102 : f32
    %53 = vector.broadcast %cst_40 : f32 to vector<22x32xf32>
    %54 = arith.mulf %53, %52 : vector<22x32xf32>
    %c1_41 = arith.constant 1 : index
    %c0_42 = arith.constant 0 : index
    %55 = vector.load %arg12[%c1_41, %c0_42] : memref<24x32xf32, #tpu.memory_space<vmem>>, vector<22x32xf32>
    tpu.vector_store %arg12[%c1_41, %c0_42], %54 {strides = array<i32>} : memref<24x32xf32, #tpu.memory_space<vmem>>, vector<22x32xf32>,
    %c0_43 = arith.constant 0 : index
    %c0_44 = arith.constant 0 : index
    %56 = vector.load %arg12[%c0_43, %c0_44] : memref<24x32xf32, #tpu.memory_space<vmem>>, vector<20x32xf32>
    %c1_45 = arith.constant 1 : index
    %c0_46 = arith.constant 0 : index
    %57 = vector.load %arg12[%c1_45, %c0_46] : memref<24x32xf32, #tpu.memory_space<vmem>>, vector<20x32xf32>
    %c2_47 = arith.constant 2 : index
    %c0_48 = arith.constant 0 : index
    %58 = vector.load %arg12[%c2_47, %c0_48] : memref<24x32xf32, #tpu.memory_space<vmem>>, vector<20x32xf32>
    %c3_49 = arith.constant 3 : index
    %c0_50 = arith.constant 0 : index
    %59 = vector.load %arg12[%c3_49, %c0_50] : memref<24x32xf32, #tpu.memory_space<vmem>>, vector<20x32xf32>
    %c4_51 = arith.constant 4 : index
    %c0_52 = arith.constant 0 : index
    %60 = vector.load %arg12[%c4_51, %c0_52] : memref<24x32xf32, #tpu.memory_space<vmem>>, vector<20x32xf32>
    %61 = tpu.concatenate %56, %57, %58, %59, %60 in 1 : vector<20x32xf32>, vector<20x32xf32>, vector<20x32xf32>, vector<20x32xf32>, vector<20x32xf32> -> vector<20x160xf32>
    %c0_53 = arith.constant 0 : index
    %c0_54 = arith.constant 0 : index
    %62 = vector.load %arg7[%c0_53, %c0_54] : memref<160x32xf32, #tpu.memory_space<vmem>>, vector<160x32xf32>
    %cst_55 = arith.constant dense<0.000000e+00> : vector<20x32xf32>
    %63 = tpu.matmul %61, %62, %cst_55 {dimension_numbers = #tpu.dot_dimension_numbers<[1], [0], [0], [1], [0, 0, 1, 1], [], []>} : vector<20x160xf32>, vector<160x32xf32>, vector<20x32xf32> -> vector<20x32xf32>
    %c0_56 = arith.constant 0 : index
    %c0_57 = arith.constant 0 : index
    %64 = vector.load %arg8[%c0_56, %c0_57] : memref<1x32xf32, #tpu.memory_space<vmem>>, vector<1x32xf32>
    %65 = vector.broadcast %64 : vector<1x32xf32> to vector<20x32xf32>
    %66 = arith.mulf %63, %65 : vector<20x32xf32>
    %c0_58 = arith.constant 0 : index
    %c0_59 = arith.constant 0 : index
    %67 = vector.load %arg9[%c0_58, %c0_59] : memref<1x32xf32, #tpu.memory_space<vmem>>, vector<1x32xf32>
    %68 = vector.broadcast %67 : vector<1x32xf32> to vector<20x32xf32>
    %69 = arith.addf %66, %68 : vector<20x32xf32>
    %cst_60 = arith.constant 0.000000e+00 : f32
    %70 = vector.broadcast %cst_60 : f32 to vector<20x32xf32>
    %71 = arith.cmpf ogt, %69, %70 : vector<20x32xf32>
    %cst_61 = arith.constant 0.000000e+00 : f32
    %72 = vector.broadcast %cst_61 : f32 to vector<20x32xf32>
    %73 = arith.minimumf %69, %72 : vector<20x32xf32>
    %74 = math.exp %73 : vector<20x32xf32>
    %cst_62 = arith.constant 1.000000e+00 : f32
    %75 = vector.broadcast %cst_62 : f32 to vector<20x32xf32>
    %76 = arith.subf %74, %75 : vector<20x32xf32>
    %cst_63 = arith.constant 1.67326319 : f32
    %77 = vector.broadcast %cst_63 : f32 to vector<20x32xf32>
    %78 = arith.mulf %77, %76 : vector<20x32xf32>
    %79 = arith.select %71, %69, %78 : vector<20x32xi1>, vector<20x32xf32>
    %cst_64 = arith.constant 1.05070102 : f32
    %80 = vector.broadcast %cst_64 : f32 to vector<20x32xf32>
    %81 = arith.mulf %80, %79 : vector<20x32xf32>
    %c0_65 = arith.constant 0 : index
    %c0_66 = arith.constant 0 : index
    %c0_67 = arith.constant 0 : index
    %82 = vector.load %arg10[%c0_65, %c0_66, %c0_67] : memref<2x20x32xf32, #tpu.memory_space<vmem>>, vector<1x20x32xf32>
    %83 = vector.shape_cast %82 : vector<1x20x32xf32> to vector<20x32xf32>
    %84 = vector.shape_cast %81 : vector<20x32xf32> to vector<1x20x32xf32>
    tpu.vector_store %arg10[%c0_65, %c0_66, %c0_67], %84 {strides = array<i32>} : memref<2x20x32xf32, #tpu.memory_space<vmem>>, vector<1x20x32xf32>,
    %85 = vector.extract_strided_slice %21 {offsets = [29, 0], sizes = [29, 64], strides = [1, 1]} : vector<58x64xf32> to vector<29x64xf32>
    %c1_68 = arith.constant 1 : index
    %c0_69 = arith.constant 0 : index
    %86 = vector.load %arg11[%c1_68, %c0_69] : memref<31x64xf32, #tpu.memory_space<vmem>>, vector<29x64xf32>
    tpu.vector_store %arg11[%c1_68, %c0_69], %85 {strides = array<i32>} : memref<31x64xf32, #tpu.memory_space<vmem>>, vector<29x64xf32>,
    %c0_70 = arith.constant 0 : index
    %c0_71 = arith.constant 0 : index
    %87 = vector.load %arg11[%c0_70, %c0_71] : memref<31x64xf32, #tpu.memory_space<vmem>>, vector<22x64xf32>
    %c1_72 = arith.constant 1 : index
    %c0_73 = arith.constant 0 : index
    %88 = vector.load %arg11[%c1_72, %c0_73] : memref<31x64xf32, #tpu.memory_space<vmem>>, vector<22x64xf32>
    %c2_74 = arith.constant 2 : index
    %c0_75 = arith.constant 0 : index
    %89 = vector.load %arg11[%c2_74, %c0_75] : memref<31x64xf32, #tpu.memory_space<vmem>>, vector<22x64xf32>
    %c3_76 = arith.constant 3 : index
    %c0_77 = arith.constant 0 : index
    %90 = vector.load %arg11[%c3_76, %c0_77] : memref<31x64xf32, #tpu.memory_space<vmem>>, vector<22x64xf32>
    %c4_78 = arith.constant 4 : index
    %c0_79 = arith.constant 0 : index
    %91 = vector.load %arg11[%c4_78, %c0_79] : memref<31x64xf32, #tpu.memory_space<vmem>>, vector<22x64xf32>
    %c5_80 = arith.constant 5 : index
    %c0_81 = arith.constant 0 : index
    %92 = vector.load %arg11[%c5_80, %c0_81] : memref<31x64xf32, #tpu.memory_space<vmem>>, vector<22x64xf32>
    %c6_82 = arith.constant 6 : index
    %c0_83 = arith.constant 0 : index
    %93 = vector.load %arg11[%c6_82, %c0_83] : memref<31x64xf32, #tpu.memory_space<vmem>>, vector<22x64xf32>
    %c7_84 = arith.constant 7 : index
    %c0_85 = arith.constant 0 : index
    %94 = vector.load %arg11[%c7_84, %c0_85] : memref<31x64xf32, #tpu.memory_space<vmem>>, vector<22x64xf32>
    %c8_86 = arith.constant 8 : index
    %c0_87 = arith.constant 0 : index
    %95 = vector.load %arg11[%c8_86, %c0_87] : memref<31x64xf32, #tpu.memory_space<vmem>>, vector<22x64xf32>
    %c9_88 = arith.constant 9 : index
    %c0_89 = arith.constant 0 : index
    %96 = vector.load %arg11[%c9_88, %c0_89] : memref<31x64xf32, #tpu.memory_space<vmem>>, vector<22x64xf32>
    %97 = tpu.concatenate %87, %88, %89, %90, %91, %92, %93, %94, %95, %96 in 1 : vector<22x64xf32>, vector<22x64xf32>, vector<22x64xf32>, vector<22x64xf32>, vector<22x64xf32>, vector<22x64xf32>, vector<22x64xf32>, vector<22x64xf32>, vector<22x64xf32>, vector<22x64xf32> -> vector<22x640xf32>
    %c0_90 = arith.constant 0 : index
    %c0_91 = arith.constant 0 : index
    %98 = vector.load %arg4[%c0_90, %c0_91] : memref<640x32xf32, #tpu.memory_space<vmem>>, vector<640x32xf32>
    %cst_92 = arith.constant dense<0.000000e+00> : vector<22x32xf32>
    %99 = tpu.matmul %97, %98, %cst_92 {dimension_numbers = #tpu.dot_dimension_numbers<[1], [0], [0], [1], [0, 0, 1, 1], [], []>} : vector<22x640xf32>, vector<640x32xf32>, vector<22x32xf32> -> vector<22x32xf32>
    %c0_93 = arith.constant 0 : index
    %c0_94 = arith.constant 0 : index
    %100 = vector.load %arg5[%c0_93, %c0_94] : memref<1x32xf32, #tpu.memory_space<vmem>>, vector<1x32xf32>
    %101 = vector.broadcast %100 : vector<1x32xf32> to vector<22x32xf32>
    %102 = arith.mulf %99, %101 : vector<22x32xf32>
    %c0_95 = arith.constant 0 : index
    %c0_96 = arith.constant 0 : index
    %103 = vector.load %arg6[%c0_95, %c0_96] : memref<1x32xf32, #tpu.memory_space<vmem>>, vector<1x32xf32>
    %104 = vector.broadcast %103 : vector<1x32xf32> to vector<22x32xf32>
    %105 = arith.addf %102, %104 : vector<22x32xf32>
    %cst_97 = arith.constant 0.000000e+00 : f32
    %106 = vector.broadcast %cst_97 : f32 to vector<22x32xf32>
    %107 = arith.cmpf ogt, %105, %106 : vector<22x32xf32>
    %cst_98 = arith.constant 0.000000e+00 : f32
    %108 = vector.broadcast %cst_98 : f32 to vector<22x32xf32>
    %109 = arith.minimumf %105, %108 : vector<22x32xf32>
    %110 = math.exp %109 : vector<22x32xf32>
    %cst_99 = arith.constant 1.000000e+00 : f32
    %111 = vector.broadcast %cst_99 : f32 to vector<22x32xf32>
    %112 = arith.subf %110, %111 : vector<22x32xf32>
    %cst_100 = arith.constant 1.67326319 : f32
    %113 = vector.broadcast %cst_100 : f32 to vector<22x32xf32>
    %114 = arith.mulf %113, %112 : vector<22x32xf32>
    %115 = arith.select %107, %105, %114 : vector<22x32xi1>, vector<22x32xf32>
    %cst_101 = arith.constant 1.05070102 : f32
    %116 = vector.broadcast %cst_101 : f32 to vector<22x32xf32>
    %117 = arith.mulf %116, %115 : vector<22x32xf32>
    %c1_102 = arith.constant 1 : index
    %c0_103 = arith.constant 0 : index
    %118 = vector.load %arg12[%c1_102, %c0_103] : memref<24x32xf32, #tpu.memory_space<vmem>>, vector<22x32xf32>
    tpu.vector_store %arg12[%c1_102, %c0_103], %117 {strides = array<i32>} : memref<24x32xf32, #tpu.memory_space<vmem>>, vector<22x32xf32>,
    %c0_104 = arith.constant 0 : index
    %c0_105 = arith.constant 0 : index
    %119 = vector.load %arg12[%c0_104, %c0_105] : memref<24x32xf32, #tpu.memory_space<vmem>>, vector<20x32xf32>
    %c1_106 = arith.constant 1 : index
    %c0_107 = arith.constant 0 : index
    %120 = vector.load %arg12[%c1_106, %c0_107] : memref<24x32xf32, #tpu.memory_space<vmem>>, vector<20x32xf32>
    %c2_108 = arith.constant 2 : index
    %c0_109 = arith.constant 0 : index
    %121 = vector.load %arg12[%c2_108, %c0_109] : memref<24x32xf32, #tpu.memory_space<vmem>>, vector<20x32xf32>
    %c3_110 = arith.constant 3 : index
    %c0_111 = arith.constant 0 : index
    %122 = vector.load %arg12[%c3_110, %c0_111] : memref<24x32xf32, #tpu.memory_space<vmem>>, vector<20x32xf32>
    %c4_112 = arith.constant 4 : index
    %c0_113 = arith.constant 0 : index
    %123 = vector.load %arg12[%c4_112, %c0_113] : memref<24x32xf32, #tpu.memory_space<vmem>>, vector<20x32xf32>
    %124 = tpu.concatenate %119, %120, %121, %122, %123 in 1 : vector<20x32xf32>, vector<20x32xf32>, vector<20x32xf32>, vector<20x32xf32>, vector<20x32xf32> -> vector<20x160xf32>
    %c0_114 = arith.constant 0 : index
    %c0_115 = arith.constant 0 : index
    %125 = vector.load %arg7[%c0_114, %c0_115] : memref<160x32xf32, #tpu.memory_space<vmem>>, vector<160x32xf32>
    %cst_116 = arith.constant dense<0.000000e+00> : vector<20x32xf32>
    %126 = tpu.matmul %124, %125, %cst_116 {dimension_numbers = #tpu.dot_dimension_numbers<[1], [0], [0], [1], [0, 0, 1, 1], [], []>} : vector<20x160xf32>, vector<160x32xf32>, vector<20x32xf32> -> vector<20x32xf32>
    %c0_117 = arith.constant 0 : index
    %c0_118 = arith.constant 0 : index
    %127 = vector.load %arg8[%c0_117, %c0_118] : memref<1x32xf32, #tpu.memory_space<vmem>>, vector<1x32xf32>
    %128 = vector.broadcast %127 : vector<1x32xf32> to vector<20x32xf32>
    %129 = arith.mulf %126, %128 : vector<20x32xf32>
    %c0_119 = arith.constant 0 : index
    %c0_120 = arith.constant 0 : index
    %130 = vector.load %arg9[%c0_119, %c0_120] : memref<1x32xf32, #tpu.memory_space<vmem>>, vector<1x32xf32>
    %131 = vector.broadcast %130 : vector<1x32xf32> to vector<20x32xf32>
    %132 = arith.addf %129, %131 : vector<20x32xf32>
    %cst_121 = arith.constant 0.000000e+00 : f32
    %133 = vector.broadcast %cst_121 : f32 to vector<20x32xf32>
    %134 = arith.cmpf ogt, %132, %133 : vector<20x32xf32>
    %cst_122 = arith.constant 0.000000e+00 : f32
    %135 = vector.broadcast %cst_122 : f32 to vector<20x32xf32>
    %136 = arith.minimumf %132, %135 : vector<20x32xf32>
    %137 = math.exp %136 : vector<20x32xf32>
    %cst_123 = arith.constant 1.000000e+00 : f32
    %138 = vector.broadcast %cst_123 : f32 to vector<20x32xf32>
    %139 = arith.subf %137, %138 : vector<20x32xf32>
    %cst_124 = arith.constant 1.67326319 : f32
    %140 = vector.broadcast %cst_124 : f32 to vector<20x32xf32>
    %141 = arith.mulf %140, %139 : vector<20x32xf32>
    %142 = arith.select %134, %132, %141 : vector<20x32xi1>, vector<20x32xf32>
    %cst_125 = arith.constant 1.05070102 : f32
    %143 = vector.broadcast %cst_125 : f32 to vector<20x32xf32>
    %144 = arith.mulf %143, %142 : vector<20x32xf32>
    %c1_126 = arith.constant 1 : index
    %c0_127 = arith.constant 0 : index
    %c0_128 = arith.constant 0 : index
    %145 = vector.load %arg10[%c1_126, %c0_127, %c0_128] : memref<2x20x32xf32, #tpu.memory_space<vmem>>, vector<1x20x32xf32>
    %146 = vector.shape_cast %145 : vector<1x20x32xf32> to vector<20x32xf32>
    %147 = vector.shape_cast %144 : vector<20x32xf32> to vector<1x20x32xf32>
    tpu.vector_store %arg10[%c1_126, %c0_127, %c0_128], %147 {strides = array<i32>} : memref<2x20x32xf32, #tpu.memory_space<vmem>>, vector<1x20x32xf32>,
    return
  }
  func.func @transform_0(%arg0: i32) -> (i32, i32) {
    %c0_i32 = arith.constant 0 : i32
    %c0_i32_0 = arith.constant 0 : i32
    return %arg0, %c0_i32 : i32, i32
  }
  func.func @transform_1(%arg0: i32) -> (i32, i32) {
    %c0_i32 = arith.constant 0 : i32
    %c0_i32_0 = arith.constant 0 : i32
    %c0_i32_1 = arith.constant 0 : i32
    return %c0_i32, %c0_i32_0 : i32, i32
  }
  func.func @transform_2(%arg0: i32) -> (i32, i32) {
    %c0_i32 = arith.constant 0 : i32
    %c0_i32_0 = arith.constant 0 : i32
    %c0_i32_1 = arith.constant 0 : i32
    return %c0_i32, %c0_i32_0 : i32, i32
  }
  func.func @transform_3(%arg0: i32) -> (i32, i32) {
    %c0_i32 = arith.constant 0 : i32
    %c0_i32_0 = arith.constant 0 : i32
    %c0_i32_1 = arith.constant 0 : i32
    return %c0_i32, %c0_i32_0 : i32, i32
  }
  func.func @transform_4(%arg0: i32) -> (i32, i32) {
    %c0_i32 = arith.constant 0 : i32
    %c0_i32_0 = arith.constant 0 : i32
    %c0_i32_1 = arith.constant 0 : i32
    return %c0_i32, %c0_i32_0 : i32, i32
  }
  func.func @transform_5(%arg0: i32) -> (i32, i32) {
    %c0_i32 = arith.constant 0 : i32
    %c0_i32_0 = arith.constant 0 : i32
    %c0_i32_1 = arith.constant 0 : i32
    return %c0_i32, %c0_i32_0 : i32, i32
  }
  func.func @transform_6(%arg0: i32) -> (i32, i32) {
    %c0_i32 = arith.constant 0 : i32
    %c0_i32_0 = arith.constant 0 : i32
    %c0_i32_1 = arith.constant 0 : i32
    return %c0_i32, %c0_i32_0 : i32, i32
  }
  func.func @transform_7(%arg0: i32) -> (i32, i32) {
    %c0_i32 = arith.constant 0 : i32
    %c0_i32_0 = arith.constant 0 : i32
    %c0_i32_1 = arith.constant 0 : i32
    return %c0_i32, %c0_i32_0 : i32, i32
  }
  func.func @transform_8(%arg0: i32) -> (i32, i32) {
    %c0_i32 = arith.constant 0 : i32
    %c0_i32_0 = arith.constant 0 : i32
    %c0_i32_1 = arith.constant 0 : i32
    return %c0_i32, %c0_i32_0 : i32, i32
  }
  func.func @transform_9(%arg0: i32) -> (i32, i32, i32) {
    %c0_i32 = arith.constant 0 : i32
    %c0_i32_0 = arith.constant 0 : i32
    %c0_i32_1 = arith.constant 0 : i32
    return %arg0, %c0_i32, %c0_i32_0 : i32, i32, i32
  }
}

</mosaic_0001>

<bundles_post_ra>
// kernel: cnn_forward.1
= control target key start
LH: loop header
LB: loop body
LE: loop exit
PB: predicated region body
PF: predicated region fallthrough
CT: control target
= control target key end

     0   :  { %vm128_vm0 = vcmask 130048   ;;  %vm32_vm1 = vcmask 523264   ;;  %vm36_vm2 = vcmask 522240   ;;  %vm384_vm7 = vcmask 520192   ;;  %s1639_s16 = smov 32   ;;  %s1640_s20 = smov 96   ;;  %s2810_s1 = inlined_call_operand.vmem [shape: f32[400,64], index: 1, kind: input, shape index: {}]   ;;  %s2811_s0 = inlined_call_operand.vmem [shape: f32[58,400], index: 0, kind: input, shape index: {}]   ;;  %s2812_s2 = inlined_call_operand.vmem [shape: f32[1,64], index: 2, kind: input, shape index: {}]   ;;  %s2813_s3 = inlined_call_operand.vmem [shape: f32[640,32], index: 3, kind: input, shape index: {}]   ;;  %s2814_s4 = inlined_call_operand.vmem [shape: f32[1,32], index: 4, kind: input, shape index: {}]   ;;  %s2815_s5 = inlined_call_operand.vmem [shape: f32[1,32], index: 5, kind: input, shape index: {}]   ;;  %s2816_s6 = inlined_call_operand.vmem [shape: f32[160,32], index: 6, kind: input, shape index: {}]   ;;  %s2817_s7 = inlined_call_operand.vmem [shape: f32[1,32], index: 7, kind: input, shape index: {}]   ;;  %s2818_s8 = inlined_call_operand.vmem [shape: f32[1,32], index: 8, kind: input, shape index: {}]   ;;  %s2819_s9 = inlined_call_operand.vmem [shape: f32[2,20,32], index: 9, kind: output, shape index: {}]  }
   0x1   :  { %v121_v0 = vld [vmem:[%s2810_s1 + $0x178] sm:$0xff]  ;;  %v120_v2 = vld [vmem:[%s2810_s1 + $0x170] sm:$0xff]  ;;  %v119_v5 = vld [vmem:[%s2810_s1 + $0x168] sm:$0xff]  ;;  %vm920_vm8 = vcmask 523269   ;;  %vm925_vm13 = vcmask 517120   ;;  %vm38_vm14 = vcmask 261120  }
   0x2   :  { %v89_v1 = vld [vmem:[%s2810_s1 + $0x78] sm:$0xff]  ;;  %235 = vmatpush.msra.mxu2 %v121_v0  ;;  %v88_v3 = vld [vmem:[%s2810_s1 + $0x70] sm:$0xff]  ;;  %v87_v6 = vld [vmem:[%s2810_s1 + $0x68] sm:$0xff] }
   0x3   :  { %153 = vmatpush.msra.mxu0 %v89_v1  ;;  %v105_v4 = vld [vmem:[%s2810_s1 + $0xf8] sm:$0xff]  ;;  %v104_v7 = vld [vmem:[%s2810_s1 + $0xf0] sm:$0xff]  ;;  %v103_v8 = vld [vmem:[%s2810_s1 + $0xe8] sm:$0xff] }
   0x4   :  { %194 = vmatpush.msra.mxu1 %v105_v4  ;;  %236 = vmatpush.msra.mxu2 %v120_v2  ;;  %v118_v9 = vld [vmem:[%s2810_s1 + $0x160] sm:$0xff]  ;;  %v117_v12 = vld [vmem:[%s2810_s1 + $0x158] sm:$0xff]  ;;  %v116_v15 = vld [vmem:[%s2810_s1 + $0x150] sm:$0xff] }
   0x5   :  { %154 = vmatpush.msra.mxu0 %v88_v3  ;;  %v86_v10 = vld [vmem:[%s2810_s1 + $0x60] sm:$0xff]  ;;  %v85_v13 = vld [vmem:[%s2810_s1 + $0x58] sm:$0xff]  ;;  %v84_v16 = vld [vmem:[%s2810_s1 + $0x50] sm:$0xff] }
   0x6   :  { %195 = vmatpush.msra.mxu1 %v104_v7  ;;  %237 = vmatpush.msra.mxu2 %v119_v5  ;;  %v102_v11 = vld [vmem:[%s2810_s1 + $0xe0] sm:$0xff]  ;;  %v101_v14 = vld [vmem:[%s2810_s1 + $0xd8] sm:$0xff]  ;;  %v100_v17 = vld [vmem:[%s2810_s1 + $0xd0] sm:$0xff] }
   0x7   :  { %155 = vmatpush.msra.mxu0 %v87_v6  ;;  %v115_v18 = vld [vmem:[%s2810_s1 + $0x148] sm:$0xff]  ;;  %v114_v21 = vld [vmem:[%s2810_s1 + $0x140] sm:$0xff]  ;;  %v113_v24 = vld [vmem:[%s2810_s1 + $0x138] sm:$0xff] }
   0x8   :  { %196 = vmatpush.msra.mxu1 %v103_v8  ;;  %238 = vmatpush.msra.mxu2 %v118_v9  ;;  %v83_v19 = vld [vmem:[%s2810_s1 + $0x48] sm:$0xff]  ;;  %v82_v22 = vld [vmem:[%s2810_s1 + $0x40] sm:$0xff]  ;;  %v81_v25 = vld [vmem:[%s2810_s1 + $0x38] sm:$0xff] }
   0x9   :  { %156 = vmatpush.msra.mxu0 %v86_v10  ;;  %v99_v20 = vld [vmem:[%s2810_s1 + $0xc8] sm:$0xff]  ;;  %v98_v23 = vld [vmem:[%s2810_s1 + $0xc0] sm:$0xff]  ;;  %v97_v26 = vld [vmem:[%s2810_s1 + $0xb8] sm:$0xff] }
   0xa   :  { %197 = vmatpush.msra.mxu1 %v102_v11  ;;  %239 = vmatpush.msra.mxu2 %v117_v12  ;;  %v123_v27 = vld [vmem:[%s2810_s1 + $0x188] sm:$0xff]  ;;  %v112_v28 = vld [vmem:[%s2810_s1 + $0x130] sm:$0xff]  ;;  %v122_v30 = vld [vmem:[%s2810_s1 + $0x180] sm:$0xff] }
   0xb   :  { %157 = vmatpush.msra.mxu0 %v85_v13  ;;  %v80_v29 = vld [vmem:[%s2810_s1 + $0x30] sm:$0xff]  ;;  %290 = vmatpush.msra.mxu3 %v123_v27  ;;  %v45_v32 = vld [vmem:[%s2811_s0 + $0x18] sm:$0xff]  ;;  %v111_v33 = vld [vmem:[%s2810_s1 + $0x128] sm:$0xff] }
   0xc   :  { %198 = vmatpush.msra.mxu1 %v101_v14  ;;  %240 = vmatpush.msra.mxu2 %v116_v15  ;;  %v96_v31 = vld [vmem:[%s2810_s1 + $0xb0] sm:$0xff]  ;;  %v79_v34 = vld [vmem:[%s2810_s1 + $0x28] sm:$0xff]  ;;  %v110_v36 = vld [vmem:[%s2810_s1 + $0x120] sm:$0xff]  ;;  %v2820_v14 = vmov 0.0  }
   0xd   :  { %158 = vmatpush.msra.mxu0 %v84_v16  ;;  %291 = vmatpush.msra.mxu3 %v122_v30  ;;  %v95_v35 = vld [vmem:[%s2810_s1 + $0xa8] sm:$0xff]  ;;  %v78_v37 = vld [vmem:[%s2810_s1 + $0x20] sm:$0xff]  ;;  %v109_v39 = vld [vmem:[%s2810_s1 + $0x118] sm:$0xff]  ;;  %33 = vst.msk [vmem:[#allocation2] sm:$0xff] %vm32_vm1, %v2820_v14 }
   0xe   :  { %199 = vmatpush.msra.mxu1 %v100_v17  ;;  %241 = vmatpush.msra.mxu2 %v115_v18  ;;  %v94_v38 = vld [vmem:[%s2810_s1 + $0xa0] sm:$0xff]  ;;  %v77_v40 = vld [vmem:[%s2810_s1 + $0x18] sm:$0xff]  ;;  %v108_v42 = vld [vmem:[%s2810_s1 + $0x110] sm:$0xff]  ;;  %34 = vst.msk [vmem:[#allocation2 + $0x8] sm:$0xff] %vm32_vm1, %v2820_v14 }
   0xf   :  { %159 = vmatpush.msra.mxu0 %v83_v19  ;;  %1463 = vmatmul.msk.f32.vlgmr.msra.gmra.mxu3 %vm128_vm0, %v45_v32  ;;  %v93_v41 = vld [vmem:[%s2810_s1 + $0x98] sm:$0xff]  ;;  %v76_v43 = vld [vmem:[%s2810_s1 + $0x10] sm:$0xff]  ;;  %v107_v46 = vld [vmem:[%s2810_s1 + $0x108] sm:$0xff]  ;;  %35 = vst.msk [vmem:[#allocation2 + $0x10] sm:$0xff] %vm32_vm1, %v2820_v14 }
  0x10   :  { %200 = vmatpush.msra.mxu1 %v99_v20  ;;  %242 = vmatpush.msra.mxu2 %v114_v21  ;;  %v92_v44 = vld [vmem:[%s2810_s1 + $0x90] sm:$0xff]  ;;  %v49_v45 = vld [vmem:[%s2811_s0 + $0x38] sm:$0xff]  ;;  %v75_v47 = vld [vmem:[%s2810_s1 + $0x8] sm:$0xff]  ;;  %37 = vst.msk [vmem:[#allocation2 + $0x18] sm:$0x7f] %vm36_vm2, %v2820_v14 }
  0x11   :  { %160 = vmatpush.msra.mxu0 %v82_v22  ;;  %v91_v48 = vld [vmem:[%s2810_s1 + $0x88] sm:$0xff]  ;;  %v106_v49 = vld [vmem:[%s2810_s1 + $0x100] sm:$0xff]  ;;  %v44_v51 = vld [vmem:[%s2811_s0 + $0x10] sm:$0xff] }
  0x12   :  { %201 = vmatpush.msra.mxu1 %v98_v23  ;;  %243 = vmatpush.msra.mxu2 %v113_v24  ;;  %v74_v50 = vld [vmem:[%s2810_s1] sm:$0xff]  ;;  %v43_v54 = vld [vmem:[%s2811_s0 + $0x8] sm:$0xff]  ;;  %v53_v55 = vld [vmem:[%s2811_s0 + $0x58] sm:$0xff] }
  0x13   :  { %161 = vmatpush.msra.mxu0 %v81_v25  ;;  %v42_v52 = vld [vmem:[%s2811_s0] sm:$0xff]  ;;  %v48_v56 = vld [vmem:[%s2811_s0 + $0x30] sm:$0xff]  ;;  %v47_v58 = vld [vmem:[%s2811_s0 + $0x28] sm:$0xff] }
  0x14   :  { %202 = vmatpush.msra.mxu1 %v97_v26  ;;  %244 = vmatpush.msra.mxu2 %v112_v28  ;;  %v90_v53 = vld [vmem:[%s2810_s1 + $0x80] sm:$0xff]  ;;  %v57_v59 = vld [vmem:[%s2811_s0 + $0x78] sm:$0xff]  ;;  %v52_v60 = vld [vmem:[%s2811_s0 + $0x50] sm:$0xff] }
  0x15   :  { %162 = vmatpush.msra.mxu0 %v80_v29  ;;  %v46_v57 = vld [vmem:[%s2811_s0 + $0x20] sm:$0xff]  ;;  %v51_v62 = vld [vmem:[%s2811_s0 + $0x48] sm:$0xff]  ;;  %v61_v63 = vld [vmem:[%s2811_s0 + $0x98] sm:$0xff] }
  0x16   :  { %203 = vmatpush.msra.mxu1 %v96_v31  ;;  %245 = vmatpush.msra.mxu2 %v111_v33  ;;  %v50_v61 = vld [vmem:[%s2811_s0 + $0x40] sm:$0xff]  ;;  %v56_v0 = vld [vmem:[%s2811_s0 + $0x70] sm:$0xff]  ;;  %v55_v2 = vld [vmem:[%s2811_s0 + $0x68] sm:$0xff] }
  0x17   :  { %163 = vmatpush.msra.mxu0 %v79_v34  ;;  %1464 = vmatmul.msk.f32.gmra.mxu3 %vm128_vm0, %v49_v45  ;;  %v54_v1 = vld [vmem:[%s2811_s0 + $0x60] sm:$0xff]  ;;  %v65_v3 = vld [vmem:[%s2811_s0 + $0xb8] sm:$0xff]  ;;  %v60_v4 = vld [vmem:[%s2811_s0 + $0x90] sm:$0xff] }
  0x18   :  { %204 = vmatpush.msra.mxu1 %v95_v35  ;;  %246 = vmatpush.msra.mxu2 %v110_v36  ;;  %v58_v5 = vld [vmem:[%s2811_s0 + $0x80] sm:$0xff]  ;;  %v59_v6 = vld [vmem:[%s2811_s0 + $0x88] sm:$0xff]  ;;  %v69_v7 = vld [vmem:[%s2811_s0 + $0xd8] sm:$0xff] }
  0x19   :  { %164 = vmatpush.msra.mxu0 %v78_v37  ;;  %v64_v8 = vld [vmem:[%s2811_s0 + $0xb0] sm:$0xff]  ;;  %v62_v9 = vld [vmem:[%s2811_s0 + $0xa0] sm:$0xff]  ;;  %v63_v10 = vld [vmem:[%s2811_s0 + $0xa8] sm:$0xff] }
  0x1a   :  { %205 = vmatpush.msra.mxu1 %v94_v38  ;;  %247 = vmatpush.msra.mxu2 %v109_v39  ;;  %v68_v11 = vld [vmem:[%s2811_s0 + $0xd0] sm:$0xff]  ;;  %v66_v12 = vld [vmem:[%s2811_s0 + $0xc0] sm:$0xff]  ;;  %v67_v13 = vld [vmem:[%s2811_s0 + $0xc8] sm:$0xff] }
  0x1b   :  { %165 = vmatpush.msra.mxu0 %v77_v40  ;;  %v1941_v16 = vld [vmem:[%s2812_s2] ss:$0 sm:$0xff]  ;;  %s1638_s2 = smov 64  }
  0x1c   :  { %206 = vmatpush.msra.mxu1 %v93_v41  ;;  %248 = vmatpush.msra.mxu2 %v108_v42  ;;  %v2360_v14 = vld [vmem:[%s2813_s3 + $0x180] sm:$0xff] }
  0x1d   :  { %166 = vmatpush.msra.mxu0 %v76_v43  ;;  %2837 = vst [vmem:[#allocation9_spill] sm:$0xff] %v2360_v14 }
  0x1e   :  { %207 = vmatpush.msra.mxu1 %v92_v44  ;;  %249 = vmatpush.msra.mxu2 %v107_v46 }
  0x1f   :  { %167 = vmatpush.msra.mxu0 %v75_v47  ;;  %1465 = vmatmul.msk.f32.gmra.mxu3 %vm128_vm0, %v53_v55 }
  0x20   :  { %208 = vmatpush.msra.mxu1 %v91_v48  ;;  %250 = vmatpush.msra.mxu2 %v106_v49 }
  0x21   :  { %168 = vmatpush.msra.mxu0 %v74_v50  ;;  %251 = vmatmul.f32.vlgmr.msra.gmra.mxu2 %v44_v51 }
  0x22   :  { %169 = vmatmul.f32.vlgmr.msra.gmra.mxu0 %v42_v52  ;;  %209 = vmatpush.msra.mxu1 %v90_v53 }
  0x23   :  { %210 = vmatmul.f32.vlgmr.msra.gmra.mxu1 %v43_v54 }
  0x27   :  { %1466 = vmatmul.msk.f32.gmra.mxu3 %vm128_vm0, %v57_v59 }
  0x29   :  { %254 = vmatmul.f32.gmra.mxu2 %v48_v56 }
  0x2a   :  { %172 = vmatmul.f32.gmra.mxu0 %v46_v57 }
  0x2b   :  { %213 = vmatmul.f32.gmra.mxu1 %v47_v58 }
  0x2f   :  { %1467 = vmatmul.msk.f32.gmra.mxu3 %vm128_vm0, %v61_v63 }
  0x31   :  { %257 = vmatmul.f32.gmra.mxu2 %v52_v60 }
  0x32   :  { %175 = vmatmul.f32.gmra.mxu0 %v50_v61 }
  0x33   :  { %216 = vmatmul.f32.gmra.mxu1 %v51_v62 }
  0x37   :  { %1468 = vmatmul.msk.f32.gmra.mxu3 %vm128_vm0, %v65_v3 }
  0x39   :  { %260 = vmatmul.f32.gmra.mxu2 %v56_v0 }
  0x3a   :  { %178 = vmatmul.f32.gmra.mxu0 %v54_v1 }
  0x3b   :  { %219 = vmatmul.f32.gmra.mxu1 %v55_v2 }
  0x3f   :  { %1469 = vmatmul.msk.f32.gmra.mxu3 %vm128_vm0, %v69_v7 }
  0x41   :  { %263 = vmatmul.f32.gmra.mxu2 %v60_v4 }
  0x42   :  { %181 = vmatmul.f32.gmra.mxu0 %v58_v5 }
  0x43   :  { %222 = vmatmul.f32.gmra.mxu1 %v59_v6 }
  0x49   :  { %266 = vmatmul.f32.gmra.mxu2 %v64_v8 }
  0x4a   :  { %184 = vmatmul.f32.gmra.mxu0 %v62_v9 }
  0x4b   :  { %225 = vmatmul.f32.gmra.mxu1 %v63_v10 }
  0x51   :  { %269 = vmatmul.f32.gmra.mxu2 %v68_v11 }
  0x52   :  { %187 = vmatmul.f32.gmra.mxu0 %v66_v12 }
  0x53   :  { %228 = vmatmul.f32.gmra.mxu1 %v67_v13 }
  0x92   :  { %v293_v15 = vpop.f32.mrf.mxu3 }
  0x9a   :  { %v296_v21 = vpop.f32.mrf.mxu3 }
  0x9f   :  { %v170_v17 = vpop.f32.mrf.mxu0 }
  0xa0   :  { %v171_v18 = vadd.f32 %v1941_v16, %v170_v17  ;;  %v211_v19 = vpop.f32.mrf.mxu1 }
  0xa2   :  { %v212_v20 = vadd.f32 %v211_v19, %v171_v18  ;;  %v299_v32 = vpop.f32.mrf.mxu3 }
  0xa4   :  { %v252_v22 = vpop.f32.mrf.mxu2 }
  0xa5   :  { %v253_v23 = vadd.f32 %v252_v22, %v212_v20 }
  0xa7   :  { %v173_v24 = vpop.f32.mrf.mxu0  ;;  %v294_v25 = vadd.f32 %v293_v15, %v253_v23  ;;  %v1962_v23 = vld [vmem:[%s2813_s3 + $0x78] sm:$0xff] }
  0xa8   :  { %v174_v26 = vadd.f32 %v1941_v16, %v173_v24  ;;  %v214_v27 = vpop.f32.mrf.mxu1  ;;  %v1967_v24 = vld [vmem:[%s2813_s3 + $0x70] sm:$0xff]  ;;  %564 = vmatpush.msrb.mxu3 %v1962_v23 }
  0xa9   :  { %v325_v28 = vmin.f32 %v294_v25, 0.0  ;;  %vm317_vm3 = vcmp.gt.f32.partialorder %v294_v25, 0.0 }
  0xaa   :  { %v215_v29 = vadd.f32 %v214_v27, %v174_v26  ;;  %v302_v47 = vpop.f32.mrf.mxu3  ;;  %565 = vmatpush.msrb.mxu3 %v1967_v24 }
  0xab   :  { %v333_v30 = vmul.f32 1.442695, %v325_v28 }
  0xac   :  { %v255_v31 = vpop.f32.mrf.mxu2 }
  0xad   :  { %1597 = vpow2.f32 %v333_v30  ;;  %v256_v33 = vadd.f32 %v255_v31, %v215_v29  ;;  %v1974_v31 = vld [vmem:[%s2813_s3 + $0x68] sm:$0xff] }
  0xae   :  { %566 = vmatpush.msrb.mxu3 %v1974_v31 }
  0xaf   :  { %v176_v34 = vpop.f32.mrf.mxu0  ;;  %v297_v35 = vadd.f32 %v296_v21, %v256_v33 }
  0xb0   :  { %v177_v36 = vadd.f32 %v1941_v16, %v176_v34  ;;  %v217_v37 = vpop.f32.mrf.mxu1  ;;  %v547_v34 = vld [vmem:[%s2813_s3 + $0x1f8] sm:$0xff] }
  0xb1   :  { %v326_v38 = vmin.f32 %v297_v35, 0.0  ;;  %vm318_vm4 = vcmp.gt.f32.partialorder %v297_v35, 0.0  ;;  %642 = vmatpush.msrb.mxu2 %v547_v34 }
  0xb2   :  { %v218_v39 = vadd.f32 %v217_v37, %v177_v36  ;;  %v305_v2 = vpop.f32.mrf.mxu3  ;;  %v1985_v36 = vld [vmem:[%s2813_s3 + $0x60] sm:$0xff]  ;;  %v1990_v37 = vld [vmem:[%s2813_s3 + $0xf8] sm:$0xff] }
  0xb3   :  { %v1598_v40 = vpop.eup %1597  ;;  %v335_v41 = vmul.f32 1.442695, %v326_v38  ;;  %v1995_v38 = vld [vmem:[%s2813_s3 + $0x178] sm:$0xff]  ;;  %590 = vmatpush.msrb.mxu0 %v1990_v37  ;;  %567 = vmatpush.msrb.mxu3 %v1985_v36 }
  0xb4   :  { %v1471_v42 = vadd.f32 -1.0, %v1598_v40  ;;  %v258_v43 = vpop.f32.mrf.mxu2  ;;  %616 = vmatpush.msrb.mxu1 %v1995_v38 }
  0xb5   :  { %1599 = vpow2.f32 %v335_v41  ;;  %v259_v44 = vadd.f32 %v258_v43, %v218_v39  ;;  %v2001_v41 = vld [vmem:[%s2813_s3 + $0x58] sm:$0xff]  ;;  %v2010_v43 = vld [vmem:[%s2813_s3 + $0xf0] sm:$0xff] }
  0xb6   :  { %v357_v45 = vmul.f32 1.6732632, %v1471_v42  ;;  %v546_v42 = vld [vmem:[%s2813_s3 + $0x1f0] sm:$0xff]  ;;  %591 = vmatpush.msrb.mxu0 %v2010_v43  ;;  %568 = vmatpush.msrb.mxu3 %v2001_v41 }
  0xb7   :  { %v179_v46 = vpop.f32.mrf.mxu0  ;;  %v300_v48 = vadd.f32 %v299_v32, %v259_v44  ;;  %643 = vmatpush.msrb.mxu2 %v546_v42 }
  0xb8   :  { %v180_v49 = vadd.f32 %v1941_v16, %v179_v46  ;;  %v365_v50 = vsel %vm317_vm3, %v294_v25, %v357_v45  ;;  %v220_v51 = vpop.f32.mrf.mxu1  ;;  %v2019_v46 = vld [vmem:[%s2813_s3 + $0x170] sm:$0xff]  ;;  %vm734_vm3 = vcmask 259072  }
  0xb9   :  { %v373_v52 = vmul.f32 1.050701, %v365_v50  ;;  %v327_v53 = vmin.f32 %v300_v48, 0.0  ;;  %vm319_vm5 = vcmp.gt.f32.partialorder %v300_v48, 0.0  ;;  %617 = vmatpush.msrb.mxu1 %v2019_v46 }
  0xba   :  { %v221_v54 = vadd.f32 %v220_v51, %v180_v49  ;;  %v308_v27 = vpop.f32.mrf.mxu3 }
  0xbb   :  { %v1600_v55 = vpop.eup %1599  ;;  %381 = vst.msk [vmem:[#allocation2 + $0x1] sm:$0xff] %vm32_vm1, %v373_v52  ;;  %v337_v56 = vmul.f32 1.442695, %v327_v53  ;;  %v2034_v52 = vld [vmem:[%s2813_s3 + $0x50] sm:$0xff]  ;;  %v2040_v53 = vld [vmem:[%s2813_s3 + $0xe8] sm:$0xff] }
  0xbc   :  { %v1472_v57 = vadd.f32 -1.0, %v1600_v55  ;;  %v261_v58 = vpop.f32.mrf.mxu2  ;;  %592 = vmatpush.msrb.mxu0 %v2040_v53  ;;  %569 = vmatpush.msrb.mxu3 %v2034_v52 }
  0xbd   :  { %1601 = vpow2.f32 %v337_v56  ;;  %v262_v59 = vadd.f32 %v261_v58, %v221_v54  ;;  %v70_v54 = vld [vmem:[%s2811_s0 + $0xe0] sm:$0x3] }
  0xbe   :  { %v358_v60 = vmul.f32 1.6732632, %v1472_v57  ;;  %190 = vmatmul.f32.gmra.mxu0 %v70_v54 }
  0xbf   :  { %v182_v61 = vpop.f32.mrf.mxu0  ;;  %v1949_v62 = vadd.f32 %v302_v47, %v262_v59  ;;  %v545_v47 = vld [vmem:[%s2813_s3 + $0x1e8] sm:$0xff] }
  0xc0   :  { %v183_v63 = vadd.f32 %v1941_v16, %v182_v61  ;;  %v366_v0 = vsel %vm318_vm4, %v297_v35, %v358_v60  ;;  %v223_v1 = vpop.f32.mrf.mxu1  ;;  %v2049_v59 = vld [vmem:[%s2813_s3 + $0x48] sm:$0xff]  ;;  %644 = vmatpush.msrb.mxu2 %v545_v47  ;;  %v73_v60 = vld [vmem:[%s2811_s0 + $0xf8] sm:$0x3]  ;;  %vm793_vm4 = vcmask 785408  }
  0xc1   :  { %v374_v3 = vmul.f32 1.050701, %v366_v0  ;;  %v328_v4 = vmin.f32 %v1949_v62, 0.0  ;;  %vm320_vm6 = vcmp.gt.f32.partialorder %v1949_v62, 0.0  ;;  %1470 = vmatmul.msk.f32.gmra.mxu3 %vm128_vm0, %v73_v60  ;;  %v2161_v60 = vld [vmem:[%s2813_s3 + $0x20] sm:$0xff] }
  0xc2   :  { %v224_v5 = vadd.f32 %v223_v1, %v183_v63  ;;  %v389_v6 = vld [vmem:[#allocation2 + $0x1] sm:$0xff]  ;;  %570 = vmatpush.msrb.mxu3 %v2049_v59 }
  0xc3   :  { %v1602_v7 = vpop.eup %1601  ;;  %382 = vst.msk [vmem:[#allocation2 + $0x9] sm:$0xff] %vm32_vm1, %v374_v3  ;;  %v339_v8 = vmul.f32 1.442695, %v328_v4  ;;  %417 = vrot.lane.b32.xlu0 %v389_v6, %s1638_s2 }
  0xc4   :  { %v1473_v9 = vadd.f32 -1.0, %v1602_v7  ;;  %v264_v10 = vpop.f32.mrf.mxu2 }
  0xc5   :  { %1603 = vpow2.f32 %v339_v8  ;;  %v265_v11 = vadd.f32 %v264_v10, %v224_v5  ;;  %v311_v8 = vpop.f32.mrf.mxu3  ;;  %v2068_v10 = vld [vmem:[%s2813_s3 + $0x168] sm:$0xff] }
  0xc6   :  { %v359_v12 = vmul.f32 1.6732632, %v1473_v9  ;;  %v2063_v9 = vld [vmem:[%s2813_s3 + $0x40] sm:$0xff]  ;;  %618 = vmatpush.msrb.mxu1 %v2068_v10 }
  0xc7   :  { %v185_v13 = vpop.f32.mrf.mxu0  ;;  %v1955_v15 = vadd.f32 %v305_v2, %v265_v11  ;;  %571 = vmatpush.msrb.mxu3 %v2063_v9 }
  0xc8   :  { %v186_v17 = vadd.f32 %v1941_v16, %v185_v13  ;;  %v367_v18 = vsel %vm319_vm5, %v300_v48, %v359_v12  ;;  %v226_v19 = vpop.f32.mrf.mxu1  ;;  %v72_v48 = vld [vmem:[%s2811_s0 + $0xf0] sm:$0x3]  ;;  %v544_v12 = vld [vmem:[%s2813_s3 + $0x1e0] sm:$0xff]  ;;  %v71_v13 = vld [vmem:[%s2811_s0 + $0xe8] sm:$0x3] }
  0xc9   :  { %v375_v20 = vmul.f32 1.050701, %v367_v18  ;;  %v329_v21 = vmin.f32 %v1955_v15, 0.0  ;;  %272 = vmatmul.f32.gmra.mxu2 %v72_v48  ;;  %vm321_vm9 = vcmp.gt.f32.partialorder %v1955_v15, 0.0  ;;  %231 = vmatmul.f32.gmra.mxu1 %v71_v13 }
  0xca   :  { %v227_v22 = vadd.f32 %v226_v19, %v186_v17  ;;  %v395_v25 = vld [vmem:[#allocation2 + $0x3] sm:$0xff]  ;;  %645 = vmatpush.msrb.mxu2 %v544_v12 }
  0xcb   :  { %v407_v26 = vld [vmem:[#allocation2 + $0x7] sm:$0xff]  ;;  %v1604_v28 = vpop.eup %1603  ;;  %383 = vst.msk [vmem:[#allocation2 + $0x11] sm:$0xff] %vm32_vm1, %v375_v20  ;;  %v341_v29 = vmul.f32 1.442695, %v329_v21 }
  0xcc   :  { %v1513_v30 = vpack.i.bf16 %v395_v25, %v407_v26  ;;  %v1474_v32 = vadd.f32 -1.0, %v1604_v28  ;;  %v267_v33 = vpop.f32.mrf.mxu2  ;;  %v401_v51 = vld [vmem:[#allocation2 + $0x5] sm:$0xff]  ;;  %v2100_v25 = vld [vmem:[%s2813_s3 + $0x38] sm:$0xff] }
  0xcd   :  { %1605 = vpow2.f32 %v341_v29  ;;  %v268_v35 = vadd.f32 %v267_v33, %v227_v22  ;;  %v390_v58 = vld [vmem:[#allocation2 + $0x9] sm:$0xff]  ;;  %v2079_v17 = vld [vmem:[#allocation2] sm:$0xff]  ;;  %v543_v26 = vld [vmem:[%s2813_s3 + $0x1d8] sm:$0xff]  ;;  %572 = vmatpush.msrb.mxu3 %v2100_v25 }
  0xce   :  { %1514 = vrot.lane.b32.xlu1 %v1513_v30, %s1638_s2  ;;  %v360_v39 = vmul.f32 1.6732632, %v1474_v32  ;;  %v2086_v19 = vld [vmem:[%s2813_s3 + $0xe0] sm:$0xff]  ;;  %v2114_v30 = vld [vmem:[%s2813_s3 + $0xd8] sm:$0xff]  ;;  %646 = vmatpush.msrb.mxu2 %v543_v26  ;;  %v2196_v26 = vld [vmem:[%s2813_s3 + $0xc8] sm:$0xff] }
  0xcf   :  { %v188_v40 = vpop.f32.mrf.mxu0  ;;  %v2012_v44 = vadd.f32 %v308_v27, %v268_v35  ;;  %v2091_v20 = vld [vmem:[%s2813_s3 + $0x160] sm:$0xff]  ;;  %v2119_v32 = vld [vmem:[%s2813_s3 + $0x158] sm:$0xff]  ;;  %593 = vmatpush.msrb.mxu0 %v2086_v19  ;;  %v2132_v35 = vld [vmem:[%s2813_s3 + $0x28] sm:$0xff] }
  0xd0   :  { %v189_v45 = vadd.f32 %v1941_v16, %v188_v40  ;;  %v368_v49 = vsel %vm320_vm6, %v1949_v62, %v360_v39  ;;  %v229_v50 = vpop.f32.mrf.mxu1  ;;  %v2093_v21 = vld [vmem:[#allocation2 + $0x2] sm:$0xff]  ;;  %619 = vmatpush.msrb.mxu1 %v2091_v20  ;;  %v542_v39 = vld [vmem:[%s2813_s3 + $0x1d0] sm:$0xff] }
  0xd1   :  { %v376_v55 = vmul.f32 1.050701, %v368_v49  ;;  %v330_v56 = vmin.f32 %v2012_v44, 0.0  ;;  %594 = vmatpush.msrb.mxu0 %v2114_v30  ;;  %647 = vmatpush.msrb.mxu2 %v542_v39  ;;  %vm322_vm10 = vcmp.gt.f32.partialorder %v2012_v44, 0.0  ;;  %v2230_v39 = vld [vmem:[%s2813_s3 + $0xb8] sm:$0xff] }
  0xd2   :  { %v230_v57 = vadd.f32 %v229_v50, %v189_v45  ;;  %v396_v61 = vld [vmem:[#allocation2 + $0xb] sm:$0xff]  ;;  %v397_v29 = vld [vmem:[#allocation2 + $0x13] sm:$0x3f]  ;;  %620 = vmatpush.msrb.mxu1 %v2119_v32 }
  0xd3   :  { %v412_v62 = vld [vmem:[#allocation2 + $0x11] sm:$0xff]  ;;  %v1606_v0 = vpop.eup %1605  ;;  %385 = vst.msk [vmem:[#allocation2 + $0x19] sm:$0x1f] %vm384_vm7, %v376_v55  ;;  %v343_v1 = vmul.f32 1.442695, %v330_v56  ;;  %v2138_v45 = vld [vmem:[#allocation2 + $0x6] sm:$0xff] }
  0xd4   :  { %v408_v63 = vld [vmem:[#allocation2 + $0xf] sm:$0xff]  ;;  %v1523_v2 = vpack.i.bf16 %v412_v62, %v396_v61  ;;  %v1475_v5 = vadd.f32 -1.0, %v1606_v0  ;;  %v270_v6 = vpop.f32.mrf.mxu2  ;;  %921 = vst.msk [vmem:[#allocation2 - $0x4] sm:$0xe0] %vm920_vm8, %v376_v55  ;;  %v2146_v55 = vld [vmem:[#allocation2 + $0x4] sm:$0xff]  ;;  %vm918_vm8 = vcmask 257024  }
  0xd5   :  { %v1518_v3 = vpack.i.bf16 %v408_v63, %v401_v51  ;;  %v391_v4 = vld [vmem:[#allocation2 + $0x11] sm:$0x3f]  ;;  %1607 = vpow2.f32 %v343_v1  ;;  %v271_v11 = vadd.f32 %v270_v6, %v230_v57  ;;  %v2142_v51 = vld [vmem:[#allocation2 + $0x8] sm:$0xff] }
  0xd6   :  { %v1508_v7 = vpack.i.bf16 %v391_v4, %v390_v58  ;;  %1524 = vrot.lane.b32.xlu2 %v1523_v2, %s1638_s2  ;;  %v361_v18 = vmul.f32 1.6732632, %v1475_v5  ;;  %v402_v28 = vld [vmem:[#allocation2 + $0xd] sm:$0xff] }
  0xd7   :  { %1519 = vrot.lane.b32.xlu1 %v1518_v3, %s1638_s2  ;;  %v2095_v22 = vadd.f32 %v311_v8, %v271_v11  ;;  %v2144_v54 = vld [vmem:[#allocation2 + $0xa] sm:$0xff]  ;;  %v2172_v2 = vld [vmem:[#allocation2 + $0x12] sm:$0x3f] }
  0xd8   :  { %1509 = vrot.lane.b32.xlu0 %v1508_v7, %s1638_s2  ;;  %v369_v27 = vsel %vm321_vm9, %v1955_v15, %v361_v18  ;;  %v2125_v15 = vld [vmem:[%s2813_s3 + $0x30] sm:$0xff]  ;;  %v2191_v18 = vld [vmem:[%s2813_s3 + $0x18] sm:$0xff] }
  0xd9   :  { %v377_v33 = vmul.f32 1.050701, %v369_v27  ;;  %v331_v34 = vmin.f32 %v2095_v22, 0.0  ;;  %573 = vmatpush.msrb.mxu3 %v2125_v15  ;;  %v2152_v58 = vld [vmem:[%s2813_s3 + $0xd0] sm:$0xff]  ;;  %vm323_vm11 = vcmp.gt.f32.partialorder %v2095_v22, 0.0 }
  0xda   :  { %v409_v40 = vld [vmem:[#allocation2 + $0x17] sm:$0x3f]  ;;  %595 = vmatpush.msrb.mxu0 %v2152_v58  ;;  %v2168_v0 = vld [vmem:[#allocation2 + $0xe] sm:$0xff] }
  0xdb   :  { %v413_v42 = vld [vmem:[#allocation2 + $0x19] sm:$0x3f]  ;;  %v1608_v47 = vpop.eup %1607  ;;  %v345_v48 = vmul.f32 1.442695, %v331_v34  ;;  %v1528_v49 = vpack.i.bf16 %v409_v40, %v402_v28  ;;  %922 = vst.msk [vmem:[#allocation2 + $0x4] sm:$0xff] %vm32_vm1, %v377_v33  ;;  %574 = vmatpush.msrb.mxu3 %v2132_v35  ;;  %v2174_v3 = vld [vmem:[#allocation2 + $0xc] sm:$0xff] }
  0xdc   :  { %v1533_v50 = vpack.i.bf16 %v413_v42, %v397_v29  ;;  %v1476_v56 = vadd.f32 -1.0, %v1608_v47  ;;  %v403_v57 = vld [vmem:[#allocation2 + $0x15] sm:$0x3f]  ;;  %596 = vmatpush.msrb.mxu0 %v2196_v26  ;;  %v2216_v29 = vld [vmem:[%s2813_s3 + $0xc0] sm:$0xff]  ;;  %v2225_v34 = vld [vmem:[%s2813_s3 + $0x8] sm:$0xff] }
  0xdd   :  { %1609 = vpow2.f32 %v345_v48  ;;  %575 = vmatpush.msrb.mxu3 %v2161_v60  ;;  %v2170_v1 = vld [vmem:[#allocation2 + $0x10] sm:$0x3f]  ;;  %v2181_v11 = vld [vmem:[#allocation2 + $0x16] sm:$0x3f]  ;;  %v540_v33 = vld [vmem:[%s2813_s3 + $0x1c0] sm:$0xff] }
  0xde   :  { %1529 = vrot.lane.b32.xlu2 %v1528_v49, %s1638_s2  ;;  %v362_v61 = vmul.f32 1.6732632, %v1476_v56  ;;  %v2176_v4 = vld [vmem:[#allocation2 + $0x10] sm:$0xff]  ;;  %v2185_v13 = vld [vmem:[#allocation2 + $0x18] sm:$0x3f]  ;;  %597 = vmatpush.msrb.mxu0 %v2216_v29  ;;  %v2240_v42 = vld [vmem:[%s2813_s3 + $0x148] sm:$0xff] }
  0xdf   :  { %445 = vrot.lane.b32.xlu1 %v403_v57, %s1638_s2  ;;  %v2183_v12 = vld [vmem:[#allocation2 + $0x14] sm:$0x3f]  ;;  %576 = vmatpush.msrb.mxu3 %v2191_v18  ;;  %v2248_v47 = vld [vmem:[%s2813_s3] sm:$0xff]  ;;  %v537_v56 = vld [vmem:[%s2813_s3 + $0x1a8] sm:$0xff] }
  0xe0   :  { %1534 = vrot.lane.b32.xlu0 %v1533_v50, %s1638_s2  ;;  %v370_v62 = vsel %vm322_vm10, %v2012_v44, %v362_v61  ;;  %v2206_v27 = vld [vmem:[%s2813_s3 + $0x150] sm:$0xff]  ;;  %v539_v40 = vld [vmem:[%s2813_s3 + $0x1b8] sm:$0xff]  ;;  %598 = vmatpush.msrb.mxu0 %v2230_v39  ;;  %v2263_v50 = vld [vmem:[%s2813_s3 + $0xa8] sm:$0xff] }
  0xe1   :  { %v378_v63 = vmul.f32 1.050701, %v370_v62  ;;  %v2211_v28 = vld [vmem:[%s2813_s3 + $0x10] sm:$0xff]  ;;  %621 = vmatpush.msrb.mxu1 %v2206_v27  ;;  %v2271_v57 = vld [vmem:[%s2813_s3 + $0x140] sm:$0xff] }
  0xe2   :  { %577 = vmatpush.msrb.mxu3 %v2211_v28  ;;  %v2253_v48 = vld [vmem:[%s2813_s3 + $0xb0] sm:$0xff]  ;;  %2832 = vst [vmem:[#allocation4_spill] sm:$0xff] %v2271_v57  ;;  %v2278_v61 = vld [vmem:[%s2813_s3 + $0xa0] sm:$0xff] }
  0xe3   :  { %v1610_v5 = vpop.eup %1609  ;;  %923 = vst.msk [vmem:[#allocation2 + $0xc] sm:$0xff] %vm32_vm1, %v378_v63  ;;  %622 = vmatpush.msrb.mxu1 %v2240_v42  ;;  %v538_v49 = vld [vmem:[%s2813_s3 + $0x1b0] sm:$0xff]  ;;  %599 = vmatpush.msrb.mxu0 %v2253_v48  ;;  %v536_v62 = vld [vmem:[%s2813_s3 + $0x1a0] sm:$0xff]  ;;  %v2286_v63 = vld [vmem:[%s2813_s3 + $0x98] sm:$0xff] }
  0xe4   :  { %v1477_v6 = vadd.f32 -1.0, %v1610_v5  ;;  %578 = vmatpush.msrb.mxu3 %v2225_v34  ;;  %v2291_v5 = vld [vmem:[%s2813_s3 + $0x138] sm:$0xff] }
  0xe5   :  { %600 = vmatpush.msrb.mxu0 %v2263_v50  ;;  %623 = vmatpush.msrb.mxu1 %v2271_v57  ;;  %2833 = vst [vmem:[#allocation5_spill] sm:$0xff] %v2291_v5  ;;  %v2475_v57 = vld [vmem:[%s2813_s3 + $0x200] sm:$0xff] }
  0xe6   :  { %v363_v44 = vmul.f32 1.6732632, %v1477_v6  ;;  %579 = vmatpush.msrb.mxu3 %v2248_v47  ;;  %v2296_v6 = vld [vmem:[%s2813_s3 + $0x278] sm:$0xff] }
  0xe7   :  { %601 = vmatpush.msrb.mxu0 %v2278_v61  ;;  %624 = vmatpush.msrb.mxu1 %v2291_v5  ;;  %v2384_v5 = vld [vmem:[%s2813_s3 + $0x110] sm:$0xff] }
  0xe8   :  { %v371_v7 = vsel %vm323_vm11, %v2095_v22, %v363_v44  ;;  %v541_v22 = vld [vmem:[%s2813_s3 + $0x1c8] sm:$0xff]  ;;  %v535_v44 = vld [vmem:[%s2813_s3 + $0x198] sm:$0xff]  ;;  %668 = vmatpush.msra.mxu3 %v2296_v6  ;;  %2839 = vst [vmem:[#allocation11_spill] sm:$0xff] %v2384_v5 }
  0xe9   :  { %v379_v8 = vmul.f32 1.050701, %v371_v7  ;;  %648 = vmatpush.msrb.mxu2 %v541_v22  ;;  %v2306_v7 = vld [vmem:[%s2813_s3 + $0x130] sm:$0xff]  ;;  %602 = vmatpush.msrb.mxu0 %v2286_v63 }
  0xea   :  { %2834 = vst [vmem:[#allocation6_spill] sm:$0xff] %v2306_v7  ;;  %v2317_v22 = vld [vmem:[%s2813_s3 + $0x270] sm:$0xff]  ;;  %625 = vmatpush.msrb.mxu1 %v2306_v7  ;;  %v2377_v7 = vld [vmem:[%s2813_s3 + $0x258] sm:$0xff] }
  0xeb   :  { %924 = vst.msk [vmem:[#allocation2 + $0x14] sm:$0xff] %vm32_vm1, %v379_v8  ;;  %649 = vmatpush.msrb.mxu2 %v540_v33  ;;  %v2312_v8 = vld [vmem:[%s2813_s3 + $0x90] sm:$0xff]  ;;  %669 = vmatpush.msra.mxu3 %v2317_v22 }
  0xec   :  { %v534_v33 = vld [vmem:[%s2813_s3 + $0x190] sm:$0xff]  ;;  %603 = vmatpush.msrb.mxu0 %v2312_v8 }
  0xed   :  { %650 = vmatpush.msrb.mxu2 %v539_v40  ;;  %v2329_v40 = vld [vmem:[%s2813_s3 + $0x88] sm:$0xff] }
  0xee   :  { %604 = vmatpush.msrb.mxu0 %v2329_v40 }
  0xef   :  { %651 = vmatpush.msrb.mxu2 %v538_v49  ;;  %v2334_v49 = vld [vmem:[%s2813_s3 + $0x128] sm:$0xff] }
  0xf0   :  { %2835 = vst [vmem:[#allocation7_spill] sm:$0xff] %v2334_v49  ;;  %626 = vmatpush.msrb.mxu1 %v2334_v49  ;;  %v2365_v49 = vld [vmem:[%s2813_s3 + $0x260] sm:$0xff] }
  0xf1   :  { %652 = vmatpush.msrb.mxu2 %v537_v56  ;;  %v533_v56 = vld [vmem:[%s2813_s3 + $0x188] sm:$0xff] }
  0xf3   :  { %653 = vmatpush.msrb.mxu2 %v536_v62  ;;  %v2344_v62 = vld [vmem:[%s2813_s3 + $0x268] sm:$0xff] }
  0xf4   :  { %670 = vmatpush.msra.mxu3 %v2344_v62 }
  0xf5   :  { %654 = vmatpush.msrb.mxu2 %v535_v44  ;;  %v2349_v44 = vld [vmem:[%s2813_s3 + $0x80] sm:$0xff] }
  0xf6   :  { %605 = vmatpush.msrb.mxu0 %v2349_v44  ;;  %671 = vmatpush.msra.mxu3 %v2365_v49 }
  0xf7   :  { %655 = vmatpush.msrb.mxu2 %v534_v33  ;;  %v2354_v33 = vld [vmem:[%s2813_s3 + $0x120] sm:$0xff] }
  0xf8   :  { %2836 = vst [vmem:[#allocation8_spill] sm:$0xff] %v2354_v33  ;;  %627 = vmatpush.msrb.mxu1 %v2354_v33  ;;  %v2390_v33 = vld [vmem:[%s2813_s3 + $0x250] sm:$0xff]  ;;  %672 = vmatpush.msra.mxu3 %v2377_v7 }
  0xf9   :  { %656 = vmatpush.msrb.mxu2 %v533_v56  ;;  %v2372_v56 = vld [vmem:[%s2813_s3 + $0x118] sm:$0xff] }
  0xfa   :  { %2838 = vst [vmem:[#allocation10_spill] sm:$0xff] %v2372_v56  ;;  %628 = vmatpush.msrb.mxu1 %v2372_v56  ;;  %673 = vmatpush.msra.mxu3 %v2390_v33  ;;  %v2405_v56 = vld [vmem:[%s2813_s3 + $0x248] sm:$0xff] }
  0xfb   :  { %657 = vmatpush.msrb.mxu2 %v2360_v14  ;;  %v2400_v14 = vld [vmem:[%s2813_s3 + $0x108] sm:$0xff] }
  0xfc   :  { %629 = vmatpush.msrb.mxu1 %v2384_v5  ;;  %2840 = vst [vmem:[#allocation12_spill] sm:$0xff] %v2400_v14  ;;  %674 = vmatpush.msra.mxu3 %v2405_v56  ;;  %v2426_v5 = vld [vmem:[%s2813_s3 + $0x238] sm:$0xff] }
  0xfd   :  { %1105 = vmatpush.msra.mxu2 %v1962_v23  ;;  %v2410_v23 = vld [vmem:[%s2813_s3 + $0x100] sm:$0xff] }
  0xfe   :  { %2841 = vst [vmem:[#allocation13_spill] sm:$0xff] %v2410_v23  ;;  %630 = vmatpush.msrb.mxu1 %v2400_v14  ;;  %v2459_v14 = vld [vmem:[%s2813_s3 + $0x210] sm:$0xff] }
  0xff   :  { %1106 = vmatpush.msra.mxu2 %v1967_v24  ;;  %v2418_v24 = vld [vmem:[%s2813_s3 + $0x240] sm:$0xff] }
 0x100   :  { %631 = vmatpush.msrb.mxu1 %v2410_v23  ;;  %675 = vmatpush.msra.mxu3 %v2418_v24  ;;  %v2445_v23 = vld [vmem:[%s2813_s3 + $0x220] sm:$0xff] }
 0x101   :  { %1107 = vmatpush.msra.mxu2 %v1974_v31  ;;  %v2431_v31 = vld [vmem:[%s2813_s3 + $0x230] sm:$0xff] }
 0x102   :  { %676 = vmatpush.msra.mxu3 %v2426_v5 }
 0x103   :  { %1108 = vmatpush.msra.mxu2 %v1985_v36  ;;  %v2440_v36 = vld [vmem:[%s2813_s3 + $0x228] sm:$0xff] }
 0x104   :  { %677 = vmatpush.msra.mxu3 %v2431_v31 }
 0x105   :  { %1109 = vmatpush.msra.mxu2 %v2001_v41 }
 0x106   :  { %678 = vmatpush.msra.mxu3 %v2440_v36 }
 0x107   :  { %1110 = vmatpush.msra.mxu2 %v2034_v52  ;;  %v2454_v52 = vld [vmem:[%s2813_s3 + $0x218] sm:$0xff] }
 0x108   :  { %679 = vmatpush.msra.mxu3 %v2445_v23 }
 0x109   :  { %1111 = vmatpush.msra.mxu2 %v2049_v59 }
 0x10a   :  { %680 = vmatpush.msra.mxu3 %v2454_v52 }
 0x10b   :  { %1112 = vmatpush.msra.mxu2 %v2063_v9  ;;  %v2468_v9 = vld [vmem:[%s2813_s3 + $0x208] sm:$0xff] }
 0x10c   :  { %681 = vmatpush.msra.mxu3 %v2459_v14 }
 0x10d   :  { %1113 = vmatpush.msra.mxu2 %v2100_v25 }
 0x10e   :  { %682 = vmatpush.msra.mxu3 %v2468_v9 }
 0x10f   :  { %1114 = vmatpush.msra.mxu2 %v2125_v15 }
 0x110   :  { %683 = vmatpush.msra.mxu3 %v2475_v57 }
 0x111   :  { %1115 = vmatpush.msra.mxu2 %v2132_v35 }
 0x113   :  { %1116 = vmatpush.msra.mxu2 %v2161_v60 }
 0x115   :  { %1117 = vmatpush.msra.mxu2 %v2191_v18 }
 0x117   :  { %1118 = vmatpush.msra.mxu2 %v2211_v28 }
 0x119   :  { %1119 = vmatpush.msra.mxu2 %v2225_v34 }
 0x11b   :  { %1120 = vmatpush.msra.mxu2 %v2248_v47 }
 0x135   :  { %v418_v41 = vpop.permute.xlu0 %417 }
 0x136   :  { %v470_v59 = vsel %vm32_vm1, %v2079_v17, %v418_v41  ;;  %v2485_v41 = vpop.permute.xlu2 %1524 }
 0x137   :  { %580 = vmatmul.f32.vlgmr.msrb.gmra.mxu3 %v470_v59 }
 0x138   :  { %1131 = vmatpush.msrb.mxu3 %v1990_v37  ;;  %v1526_v37 = vunpack.i.l.bf16 %v2485_v41 }
 0x13a   :  { %1132 = vmatpush.msrb.mxu3 %v2010_v43 }
 0x13c   :  { %1133 = vmatpush.msrb.mxu3 %v2040_v53 }
 0x13e   :  { %1134 = vmatpush.msrb.mxu3 %v2086_v19  ;;  %v474_v19 = vsel %vm32_vm1, %v2144_v54, %v1526_v37  ;;  %v1530_v34 = vpop.permute.xlu2 %1529  ;;  %v1590_v37 = vld [vmem:[%s2815_s5] ss:$0 sm:$0xff] }
 0x13f   :  { %v1531_v54 = vunpack.i.l.bf16 %v1530_v34 }
 0x140   :  { %v1515_v17 = vpop.permute.xlu1 %1514  ;;  %1135 = vmatpush.msrb.mxu3 %v2114_v30 }
 0x141   :  { %v1517_v25 = vunpack.i.h.bf16 %v1515_v17  ;;  %v1516_v15 = vunpack.i.l.bf16 %v1515_v17 }
 0x142   :  { %1136 = vmatpush.msrb.mxu3 %v2152_v58 }
 0x143   :  { %v473_v35 = vsel %vm32_vm1, %v2093_v21, %v1517_v25  ;;  %v479_v60 = vsel %vm32_vm1, %v2138_v45, %v1516_v15 }
 0x144   :  { %606 = vmatmul.f32.vlgmr.msrb.gmra.mxu0 %v473_v35  ;;  %658 = vmatmul.f32.vlgmr.msrb.gmra.mxu2 %v479_v60 }
 0x145   :  { %1209 = vmatpush.msrb.mxu2 %v2296_v6  ;;  %1137 = vmatpush.msrb.mxu3 %v2196_v26  ;;  %v191_v6 = vpop.f32.mrf.mxu0 }
 0x147   :  { %1210 = vmatpush.msrb.mxu2 %v2317_v22  ;;  %1138 = vmatpush.msrb.mxu3 %v2216_v29  ;;  %v192_v29 = vadd.f32 %v1941_v16, %v191_v6 }
 0x149   :  { %v1520_v43 = vpop.permute.xlu1 %1519  ;;  %1211 = vmatpush.msrb.mxu2 %v2344_v62  ;;  %1139 = vmatpush.msrb.mxu3 %v2230_v39 }
 0x14a   :  { %v1522_v53 = vunpack.i.h.bf16 %v1520_v43  ;;  %v1521_v21 = vunpack.i.l.bf16 %v1520_v43  ;;  %v1510_v18 = vpop.permute.xlu0 %1509 }
 0x14b   :  { %v1511_v45 = vunpack.i.l.bf16 %v1510_v18  ;;  %1212 = vmatpush.msrb.mxu2 %v2365_v49  ;;  %v1512_v58 = vunpack.i.h.bf16 %v1510_v18  ;;  %1140 = vmatpush.msrb.mxu3 %v2253_v48 }
 0x14c   :  { %v476_v28 = vsel %vm32_vm1, %v2146_v55, %v1521_v21  ;;  %v480_v30 = vsel %vm32_vm1, %v2168_v0, %v1522_v53  ;;  %609 = vmatmul.f32.gmra.mxu0 %v474_v19  ;;  %v1532_v55 = vunpack.i.h.bf16 %v1530_v34  ;;  %v273_v49 = vpop.f32.mrf.mxu2 }
 0x14d   :  { %v471_v47 = vsel %vm32_vm1, %v2142_v51, %v1511_v45  ;;  %632 = vmatmul.f32.vlgmr.msrb.gmra.mxu1 %v476_v28  ;;  %661 = vmatmul.f32.gmra.mxu2 %v480_v30  ;;  %v477_v51 = vsel %vm32_vm1, %v2174_v3, %v1531_v54  ;;  %v472_v22 = vsel %vm32_vm1, %v2170_v1, %v1512_v58  ;;  %v314_v3 = vpop.f32.mrf.mxu3 }
 0x14e   :  { %583 = vmatmul.f32.gmra.mxu3 %v471_v47  ;;  %1213 = vmatpush.msrb.mxu2 %v2377_v7  ;;  %v481_v48 = vsel %vm32_vm1, %v2181_v11, %v1532_v55  ;;  %v232_v7 = vpop.f32.mrf.mxu1  ;;  %v2563_v55 = vld [vmem:[%s2816_s6 + $0x98] sm:$0xff] }
 0x14f   :  { %1141 = vmatpush.msrb.mxu3 %v2263_v50  ;;  %v233_v16 = vadd.f32 %v232_v7, %v192_v29  ;;  %864 = vmatpush.msra.mxu1 %v2563_v55 }
 0x150   :  { %1214 = vmatpush.msrb.mxu2 %v2390_v33 }
 0x151   :  { %1142 = vmatpush.msrb.mxu3 %v2278_v61  ;;  %v446_v1 = vpop.permute.xlu1 %445 }
 0x152   :  { %v1535_v0 = vpop.permute.xlu0 %1534  ;;  %1215 = vmatpush.msrb.mxu2 %v2405_v56  ;;  %v478_v11 = vsel %vm32_vm1, %v2183_v12, %v446_v1 }
 0x153   :  { %v1536_v26 = vunpack.i.l.bf16 %v1535_v0  ;;  %1143 = vmatpush.msrb.mxu3 %v2286_v63 }
 0x154   :  { %1216 = vmatpush.msrb.mxu2 %v2418_v24 }
 0x155   :  { %v475_v39 = vsel %vm32_vm1, %v2172_v2, %v1536_v26  ;;  %635 = vmatmul.f32.gmra.mxu1 %v477_v51  ;;  %664 = vmatmul.f32.gmra.mxu2 %v481_v48  ;;  %v274_v2 = vadd.f32 %v273_v49, %v233_v16  ;;  %v2574_v51 = vld [vmem:[%s2816_s6 + $0x88] sm:$0xff] }
 0x156   :  { %586 = vmatmul.f32.gmra.mxu3 %v472_v22  ;;  %612 = vmatmul.f32.gmra.mxu0 %v475_v39  ;;  %v2580_v22 = vld [vmem:[%s2816_s6 + $0x80] sm:$0xff] }
 0x157   :  { %1144 = vmatpush.msrb.mxu3 %v2312_v8  ;;  %v315_v50 = vadd.f32 %v314_v3, %v274_v2  ;;  %1217 = vmatpush.msrb.mxu2 %v2426_v5  ;;  %v1527_v8 = vunpack.i.h.bf16 %v2485_v41  ;;  %v1589_v41 = vld [vmem:[%s2814_s4] ss:$0 sm:$0xff] }
 0x159   :  { %1145 = vmatpush.msrb.mxu3 %v2329_v40  ;;  %v332_v61 = vmin.f32 %v315_v50, 0.0  ;;  %1218 = vmatpush.msrb.mxu2 %v2431_v31  ;;  %v482_v12 = vsel %vm32_vm1, %v2176_v4, %v1527_v8  ;;  %v1537_v40 = vunpack.i.h.bf16 %v1535_v0  ;;  %vm324_vm12 = vcmp.gt.f32.partialorder %v315_v50, 0.0  ;;  %v2568_v0 = vld [vmem:[%s2816_s6 + $0x90] sm:$0xff] }
 0x15a   :  { %v2842_v4 = vmov 0.0   ;;  %865 = vmatpush.msra.mxu1 %v2568_v0 }
 0x15b   :  { %1146 = vmatpush.msrb.mxu3 %v2349_v44  ;;  %v347_v63 = vmul.f32 1.442695, %v332_v61  ;;  %1219 = vmatpush.msrb.mxu2 %v2440_v36  ;;  %v483_v33 = vsel %vm32_vm1, %v2185_v13, %v1537_v40  ;;  %39 = vst.msk [vmem:[#allocation3] sm:$0xff] %vm38_vm14, %v2842_v4 }
 0x15c   :  { %40 = vst.msk [vmem:[#allocation3 + $0x8] sm:$0xff] %vm38_vm14, %v2842_v4  ;;  %866 = vmatpush.msra.mxu1 %v2574_v51 }
 0x15d   :  { %638 = vmatmul.f32.gmra.mxu1 %v478_v11  ;;  %1611 = vpow2.f32 %v347_v63  ;;  %1220 = vmatpush.msrb.mxu2 %v2445_v23  ;;  %41 = vst.msk [vmem:[#allocation3 + $0x10] sm:$0xff] %vm38_vm14, %v2842_v4  ;;  %v2846_v4 = vld [vmem:[#allocation7_spill] sm:$0xff] }
 0x15e   :  { %684 = vmatmul.f32.vlgmr.msra.gmra.mxu3 %v471_v47  ;;  %867 = vmatpush.msra.mxu1 %v2580_v22 }
 0x15f   :  { %1221 = vmatpush.msrb.mxu2 %v2454_v52 }
 0x160   :  { %1157 = vmatpush.msrb.mxu1 %v1995_v38 }
 0x161   :  { %1222 = vmatpush.msrb.mxu2 %v2459_v14 }
 0x162   :  { %1158 = vmatpush.msrb.mxu1 %v2019_v46 }
 0x163   :  { %v1612_v5 = vpop.eup %1611  ;;  %1223 = vmatpush.msrb.mxu2 %v2468_v9 }
 0x164   :  { %v1478_v62 = vadd.f32 -1.0, %v1612_v5  ;;  %1159 = vmatpush.msrb.mxu1 %v2068_v10 }
 0x165   :  { %1224 = vmatpush.msrb.mxu2 %v2475_v57 }
 0x166   :  { %687 = vmatmul.f32.gmra.mxu3 %v482_v12  ;;  %v364_v44 = vmul.f32 1.6732632, %v1478_v62  ;;  %1160 = vmatpush.msrb.mxu1 %v2091_v20  ;;  %v2844_v20 = vld [vmem:[#allocation5_spill] sm:$0xff] }
 0x168   :  { %v372_v56 = vsel %vm324_vm12, %v315_v50, %v364_v44  ;;  %1161 = vmatpush.msrb.mxu1 %v2119_v32  ;;  %v2843_v44 = vld [vmem:[#allocation4_spill] sm:$0xff] }
 0x169   :  { %v380_v23 = vmul.f32 1.050701, %v372_v56 }
 0x16a   :  { %1162 = vmatpush.msrb.mxu1 %v2206_v27 }
 0x16b   :  { %926 = vst.msk [vmem:[#allocation2 + $0x1c] sm:$0x3] %vm925_vm13, %v380_v23  ;;  %v2845_v23 = vld [vmem:[#allocation6_spill] sm:$0xff] }
 0x16c   :  { %1163 = vmatpush.msrb.mxu1 %v2240_v42  ;;  %v930_v42 = vld [vmem:[#allocation2 + $0x1] sm:$0xff] }
 0x16e   :  { %690 = vmatmul.f32.gmra.mxu3 %v483_v33  ;;  %1164 = vmatpush.msrb.mxu1 %v2843_v44  ;;  %v802_v44 = vld [vmem:[%s2816_s6 + $0x28] sm:$0xff] }
 0x170   :  { %1165 = vmatpush.msrb.mxu1 %v2844_v20  ;;  %v800_v20 = vld [vmem:[%s2816_s6 + $0x18] sm:$0xff] }
 0x172   :  { %1166 = vmatpush.msrb.mxu1 %v2845_v23  ;;  %v798_v23 = vld [vmem:[%s2816_s6 + $0x8] sm:$0xff] }
 0x174   :  { %1167 = vmatpush.msrb.mxu1 %v2846_v4  ;;  %v1088_v4 = vld [vmem:[%s2813_s3 + $0x1f8] sm:$0xff] }
 0x1ba   :  { %v581_v14 = vpop.f32.mrf.mxu3 }
 0x1c1   :  { %v607_v24 = vpop.f32.mrf.mxu0 }
 0x1c2   :  { %v608_v36 = vadd.f32 %v607_v24, %v581_v14  ;;  %v2847_v24 = vld [vmem:[#allocation8_spill] sm:$0xff] }
 0x1c3   :  { %1168 = vmatpush.msrb.mxu1 %v2847_v24  ;;  %v927_v24 = vld [vmem:[#allocation2] sm:$0xff] }
 0x1c7   :  { %v659_v52 = vpop.f32.mrf.mxu2 }
 0x1c9   :  { %v610_v9 = vpop.f32.mrf.mxu0 }
 0x1ca   :  { %v633_v31 = vpop.f32.mrf.mxu1 }
 0x1cb   :  { %v634_v59 = vadd.f32 %v633_v31, %v608_v36 }
 0x1cd   :  { %v660_v15 = vadd.f32 %v659_v52, %v634_v59 }
 0x1d0   :  { %v662_v21 = vpop.f32.mrf.mxu2 }
 0x1d1   :  { %v584_v57 = vpop.f32.mrf.mxu3 }
 0x1d2   :  { %v636_v17 = vpop.f32.mrf.mxu1  ;;  %v611_v25 = vadd.f32 %v610_v9, %v584_v57  ;;  %v2848_v9 = vld [vmem:[#allocation10_spill] sm:$0xff] }
 0x1d3   :  { %v613_v45 = vpop.f32.mrf.mxu0  ;;  %1169 = vmatpush.msrb.mxu1 %v2848_v9  ;;  %v1082_v9 = vld [vmem:[%s2813_s3 + $0x1c8] sm:$0xff] }
 0x1d4   :  { %v637_v43 = vadd.f32 %v636_v17, %v611_v25  ;;  %v812_v17 = vld [vmem:[%s2816_s6 + $0x78] sm:$0xff]  ;;  %v811_v25 = vld [vmem:[%s2816_s6 + $0x70] sm:$0xff] }
 0x1d5   :  { %826 = vmatpush.msra.mxu0 %v812_v17  ;;  %1365 = vmatpush.msra.mxu3 %v812_v17 }
 0x1d6   :  { %v663_v30 = vadd.f32 %v662_v21, %v637_v43  ;;  %v931_v43 = vld [vmem:[#allocation2 + $0x9] sm:$0xff] }
 0x1d7   :  { %827 = vmatpush.msra.mxu0 %v811_v25  ;;  %1366 = vmatpush.msra.mxu3 %v811_v25  ;;  %v1081_v25 = vld [vmem:[%s2813_s3 + $0x1c0] sm:$0xff] }
 0x1d8   :  { %v665_v39 = vpop.f32.mrf.mxu2 }
 0x1d9   :  { %v587_v13 = vpop.f32.mrf.mxu3 }
 0x1da   :  { %v614_v19 = vadd.f32 %v613_v45, %v587_v13  ;;  %v639_v34 = vpop.f32.mrf.mxu1  ;;  %v2851_v45 = vld [vmem:[#allocation13_spill] sm:$0xff] }
 0x1dc   :  { %v640_v26 = vadd.f32 %v639_v34, %v614_v19 }
 0x1de   :  { %v666_v7 = vadd.f32 %v665_v39, %v640_v26  ;;  %v943_v39 = vld [vmem:[#allocation2 + $0xd] sm:$0xff] }
 0x1e1   :  { %v685_v35 = vpop.f32.mrf.mxu3 }
 0x1e2   :  { %v686_v60 = vadd.f32 %v685_v35, %v660_v15  ;;  %v2849_v15 = vld [vmem:[#allocation11_spill] sm:$0xff]  ;;  %v2850_v35 = vld [vmem:[#allocation12_spill] sm:$0xff] }
 0x1e3   :  { %1170 = vmatpush.msrb.mxu1 %v2849_v15  ;;  %v928_v15 = vld [vmem:[#allocation2 + $0x8] sm:$0xff] }
 0x1e4   :  { %v698_v53 = vmul.f32 %v1589_v41, %v686_v60  ;;  %v936_v60 = vld [vmem:[#allocation2 + $0x3] sm:$0xff] }
 0x1e5   :  { %1171 = vmatpush.msrb.mxu1 %v2850_v35  ;;  %v1080_v35 = vld [vmem:[%s2813_s3 + $0x1b8] sm:$0xff] }
 0x1e6   :  { %v705_v18 = vadd.f32 %v1590_v37, %v698_v53 }
 0x1e7   :  { %1172 = vmatpush.msrb.mxu1 %v2851_v45  ;;  %v1074_v45 = vld [vmem:[%s2813_s3 + $0x188] sm:$0xff] }
 0x1e8   :  { %v711_v28 = vmin.f32 %v705_v18, 0.0  ;;  %vm708_vm15 = vcmp.gt.f32.partialorder %v705_v18, 0.0 }
 0x1e9   :  { %v688_v47 = vpop.f32.mrf.mxu3 }
 0x1ea   :  { %v714_v54 = vmul.f32 1.442695, %v711_v28  ;;  %v689_v58 = vadd.f32 %v688_v47, %v663_v30 }
 0x1ec   :  { %1613 = vpow2.f32 %v714_v54  ;;  %v699_v6 = vmul.f32 %v1589_v41, %v689_v58  ;;  %v937_v54 = vld [vmem:[#allocation2 + $0xb] sm:$0xff] }
 0x1ee   :  { %v706_v29 = vadd.f32 %v1590_v37, %v699_v6 }
 0x1f0   :  { %v712_v48 = vmin.f32 %v706_v29, 0.0  ;;  %vm709_vm0 = vcmp.gt.f32.partialorder %v706_v29, 0.0 }
 0x1f1   :  { %v691_v49 = vpop.f32.mrf.mxu3 }
 0x1f2   :  { %v1614_v16 = vpop.eup %1613  ;;  %v716_v1 = vmul.f32 1.442695, %v712_v48  ;;  %v692_v3 = vadd.f32 %v691_v49, %v666_v7  ;;  %v949_v48 = vld [vmem:[#allocation2 + $0xf] sm:$0xff]  ;;  %v948_v7 = vld [vmem:[#allocation2 + $0x7] sm:$0xff] }
 0x1f3   :  { %v1479_v2 = vadd.f32 -1.0, %v1614_v16  ;;  %v938_v49 = vld [vmem:[#allocation2 + $0x13] sm:$0x3f] }
 0x1f4   :  { %1615 = vpow2.f32 %v716_v1  ;;  %v700_v11 = vmul.f32 %v1589_v41, %v692_v3  ;;  %v932_v41 = vld [vmem:[#allocation2 + $0x11] sm:$0x3f]  ;;  %v1578_v1 = vpack.i.bf16 %v949_v48, %v943_v39 }
 0x1f5   :  { %v723_v50 = vmul.f32 1.6732632, %v1479_v2  ;;  %v1558_v19 = vpack.i.bf16 %v936_v60, %v932_v41  ;;  %v953_v16 = vld [vmem:[#allocation2 + $0x11] sm:$0xff] }
 0x1f6   :  { %v707_v61 = vadd.f32 %v1590_v37, %v700_v11  ;;  %v1573_v2 = vpack.i.bf16 %v938_v49, %v953_v16  ;;  %v944_v11 = vld [vmem:[#allocation2 + $0x15] sm:$0x3f] }
 0x1f7   :  { %v726_v63 = vsel %vm708_vm15, %v705_v18, %v723_v50  ;;  %v954_v50 = vld [vmem:[#allocation2 + $0x19] sm:$0x3f]  ;;  %v1079_v60 = vld [vmem:[%s2813_s3 + $0x1b0] sm:$0xff] }
 0x1f8   :  { %v729_v8 = vmul.f32 1.050701, %v726_v63  ;;  %v713_v12 = vmin.f32 %v707_v61, 0.0  ;;  %vm710_vm2 = vcmp.gt.f32.partialorder %v707_v61, 0.0  ;;  %v950_v63 = vld [vmem:[#allocation2 + $0x17] sm:$0x3f] }
 0x1f9   :  { %v929_v48 = vld [vmem:[#allocation2 + $0x10] sm:$0x3f] }
 0x1fa   :  { %v1616_v5 = vpop.eup %1615  ;;  %732 = vst.msk [vmem:[#allocation3 + $0x1] sm:$0xff] %vm38_vm14, %v729_v8  ;;  %v718_v40 = vmul.f32 1.442695, %v713_v12  ;;  %v810_v8 = vld [vmem:[%s2816_s6 + $0x68] sm:$0xff]  ;;  %v809_v12 = vld [vmem:[%s2816_s6 + $0x60] sm:$0xff] }
 0x1fb   :  { %v1480_v38 = vadd.f32 -1.0, %v1616_v5  ;;  %828 = vmatpush.msra.mxu0 %v810_v8  ;;  %1367 = vmatpush.msra.mxu3 %v810_v8  ;;  %v808_v5 = vld [vmem:[%s2816_s6 + $0x58] sm:$0xff] }
 0x1fc   :  { %1617 = vpow2.f32 %v718_v40  ;;  %v807_v40 = vld [vmem:[%s2816_s6 + $0x50] sm:$0xff] }
 0x1fd   :  { %v724_v46 = vmul.f32 1.6732632, %v1480_v38  ;;  %829 = vmatpush.msra.mxu0 %v809_v12  ;;  %1368 = vmatpush.msra.mxu3 %v809_v12  ;;  %v806_v38 = vld [vmem:[%s2816_s6 + $0x48] sm:$0xff] }
 0x1ff   :  { %v727_v10 = vsel %vm709_vm0, %v706_v29, %v724_v46  ;;  %v942_v29 = vld [vmem:[#allocation2 + $0x5] sm:$0xff]  ;;  %830 = vmatpush.msra.mxu0 %v808_v5  ;;  %1369 = vmatpush.msra.mxu3 %v808_v5 }
 0x200   :  { %v730_v62 = vmul.f32 1.050701, %v727_v10  ;;  %v1568_v3 = vpack.i.bf16 %v948_v7, %v942_v29  ;;  %v805_v46 = vld [vmem:[%s2816_s6 + $0x40] sm:$0xff]  ;;  %v804_v10 = vld [vmem:[%s2816_s6 + $0x38] sm:$0xff] }
 0x201   :  { %v739_v57 = vld [vmem:[#allocation3 + $0x1] sm:$0xff]  ;;  %831 = vmatpush.msra.mxu0 %v807_v40  ;;  %1370 = vmatpush.msra.mxu3 %v807_v40 }
 0x202   :  { %v1618_v33 = vpop.eup %1617  ;;  %733 = vst.msk [vmem:[#allocation3 + $0x9] sm:$0xff] %vm38_vm14, %v730_v62  ;;  %v803_v62 = vld [vmem:[%s2816_s6 + $0x30] sm:$0xff]  ;;  %v933_v7 = vld [vmem:[#allocation2 + $0x2] sm:$0xff] }
 0x203   :  { %v1481_v56 = vadd.f32 -1.0, %v1618_v33  ;;  %832 = vmatpush.msra.mxu0 %v806_v38  ;;  %1371 = vmatpush.msra.mxu3 %v806_v38  ;;  %v801_v33 = vld [vmem:[%s2816_s6 + $0x20] sm:$0xff] }
 0x205   :  { %v725_v32 = vmul.f32 1.6732632, %v1481_v56  ;;  %833 = vmatpush.msra.mxu0 %v805_v46  ;;  %1372 = vmatpush.msra.mxu3 %v805_v46  ;;  %v799_v56 = vld [vmem:[%s2816_s6 + $0x10] sm:$0xff] }
 0x206   :  { %v934_v46 = vld [vmem:[#allocation2 + $0xa] sm:$0xff] }
 0x207   :  { %v728_v27 = vsel %vm710_vm2, %v707_v61, %v725_v32  ;;  %v1583_v61 = vpack.i.bf16 %v944_v11, %v954_v50  ;;  %834 = vmatpush.msra.mxu0 %v804_v10  ;;  %1373 = vmatpush.msra.mxu3 %v804_v10  ;;  %v797_v32 = vld [vmem:[%s2816_s6] sm:$0xff] }
 0x208   :  { %v731_v14 = vmul.f32 1.050701, %v728_v27  ;;  %v1087_v27 = vld [vmem:[%s2813_s3 + $0x1f0] sm:$0xff] }
 0x209   :  { %v748_v31 = vld [vmem:[#allocation3 + $0x4] sm:$0xff]  ;;  %835 = vmatpush.msra.mxu0 %v803_v62  ;;  %1374 = vmatpush.msra.mxu3 %v803_v62 }
 0x20a   :  { %v742_v13 = vld [vmem:[#allocation3 + $0x2] sm:$0xff]  ;;  %735 = vst.msk [vmem:[#allocation3 + $0x11] sm:$0x3f] %vm734_vm3, %v731_v14  ;;  %1482 = vmatmul.msk.f32.vlgmr.msra.gmra.mxu1 %vm38_vm14, %v748_v31 }
 0x20b   :  { %v740_v36 = vld [vmem:[#allocation3 + $0x9] sm:$0xff]  ;;  %v1538_v52 = vpack.i.bf16 %v742_v13, %v930_v42  ;;  %1500 = vmatpush.msra.mxu1 %v2563_v55  ;;  %836 = vmatpush.msra.mxu0 %v802_v44  ;;  %v1085_v31 = vld [vmem:[%s2813_s3 + $0x1e0] sm:$0xff] }
 0x20c   :  { %v1543_v59 = vpack.i.bf16 %v740_v36, %v739_v57  ;;  %v745_v37 = vld [vmem:[#allocation3 + $0x3] sm:$0xff]  ;;  %1375 = vmatpush.msra.mxu3 %v802_v44  ;;  %v1084_v36 = vld [vmem:[%s2813_s3 + $0x1d8] sm:$0xff] }
 0x20d   :  { %1539 = vrot.lane.b32.xlu2 %v1538_v52, %s1638_s2  ;;  %1501 = vmatpush.msra.mxu1 %v2568_v0  ;;  %v1086_v57 = vld [vmem:[%s2813_s3 + $0x1e8] sm:$0xff]  ;;  %v1083_v52 = vld [vmem:[%s2813_s3 + $0x1d0] sm:$0xff] }
 0x20e   :  { %1544 = vrot.lane.b32.xlu0 %v1543_v59, %s1639_s16  ;;  %837 = vmatpush.msra.mxu0 %v801_v33  ;;  %v737_v11 = vld [vmem:[#allocation3 + $0x8] sm:$0xff] }
 0x20f   :  { %1502 = vmatpush.msra.mxu1 %v2574_v51  ;;  %1376 = vmatpush.msra.mxu3 %v801_v33 }
 0x210   :  { %838 = vmatpush.msra.mxu0 %v800_v20 }
 0x211   :  { %v749_v53 = vld [vmem:[#allocation3 + $0xc] sm:$0xff]  ;;  %v750_v47 = vld [vmem:[#allocation3 + $0x14] sm:$0xf]  ;;  %1503 = vmatpush.msra.mxu1 %v2580_v22  ;;  %1377 = vmatpush.msra.mxu3 %v800_v20 }
 0x212   :  { %v746_v21 = vld [vmem:[#allocation3 + $0xb] sm:$0xff]  ;;  %1483 = vmatmul.msk.f32.gmra.mxu1 %vm38_vm14, %v749_v53  ;;  %v747_v58 = vld [vmem:[#allocation3 + $0x13] sm:$0xf]  ;;  %839 = vmatpush.msra.mxu0 %v799_v56  ;;  %v1076_v53 = vld [vmem:[%s2813_s3 + $0x198] sm:$0xff] }
 0x213   :  { %v743_v18 = vld [vmem:[#allocation3 + $0xa] sm:$0xff]  ;;  %v1548_v28 = vpack.i.bf16 %v746_v21, %v745_v37  ;;  %v744_v34 = vld [vmem:[#allocation3 + $0x12] sm:$0xf]  ;;  %1378 = vmatpush.msra.mxu3 %v799_v56 }
 0x214   :  { %v1553_v30 = vpack.i.bf16 %v743_v18, %v931_v43  ;;  %v1563_v26 = vpack.i.bf16 %v937_v54, %v744_v34  ;;  %v741_v6 = vld [vmem:[#allocation3 + $0x11] sm:$0xf]  ;;  %840 = vmatpush.msra.mxu0 %v798_v23  ;;  %v1078_v37 = vld [vmem:[%s2813_s3 + $0x1a8] sm:$0xff]  ;;  %v1077_v43 = vld [vmem:[%s2813_s3 + $0x1a0] sm:$0xff] }
 0x215   :  { %1549 = vrot.lane.b32.xlu1 %v1548_v28, %s1640_s20  ;;  %1379 = vmatpush.msra.mxu3 %v798_v23  ;;  %v1075_v21 = vld [vmem:[%s2813_s3 + $0x190] sm:$0xff]  ;;  %v2852_v28 = vld [vmem:[#allocation9_spill] sm:$0xff] }
 0x216   :  { %1559 = vrot.lane.b32.xlu0 %v1558_v19, %s1638_s2  ;;  %1554 = vrot.lane.b32.xlu2 %v1553_v30, %s1638_s2  ;;  %v736_v30 = vld [vmem:[#allocation3] sm:$0xff] }
 0x217   :  { %841 = vmatpush.msra.mxu0 %v797_v32  ;;  %1380 = vmatpush.msra.mxu3 %v797_v32  ;;  %v939_v32 = vld [vmem:[#allocation2 + $0x4] sm:$0xff] }
 0x219   :  { %1183 = vmatpush.msrb.mxu0 %v1088_v4 }
 0x21a   :  { %1484 = vmatmul.msk.f32.gmra.mxu1 %vm38_vm14, %v750_v47 }
 0x21b   :  { %1184 = vmatpush.msrb.mxu0 %v1087_v27 }
 0x21d   :  { %758 = vrot.lane.b32.xlu1 %v741_v6, %s1639_s16  ;;  %1185 = vmatpush.msrb.mxu0 %v1086_v57 }
 0x21e   :  { %782 = vrot.lane.b32.xlu0 %v747_v58, %s1640_s20  ;;  %1564 = vrot.lane.b32.xlu2 %v1563_v26, %s1638_s2 }
 0x21f   :  { %1186 = vmatpush.msrb.mxu0 %v1085_v31 }
 0x221   :  { %1187 = vmatpush.msrb.mxu0 %v1084_v36 }
 0x223   :  { %1188 = vmatpush.msrb.mxu0 %v1083_v52 }
 0x225   :  { %1569 = vrot.lane.b32.xlu1 %v1568_v3, %s1638_s2  ;;  %1189 = vmatpush.msrb.mxu0 %v1082_v9  ;;  %v945_v9 = vld [vmem:[#allocation2 + $0x6] sm:$0xff] }
 0x226   :  { %1579 = vrot.lane.b32.xlu0 %v1578_v1, %s1638_s2  ;;  %1574 = vrot.lane.b32.xlu2 %v1573_v2, %s1638_s2 }
 0x227   :  { %1190 = vmatpush.msrb.mxu0 %v1081_v25 }
 0x229   :  { %1191 = vmatpush.msrb.mxu0 %v1080_v35 }
 0x22b   :  { %1192 = vmatpush.msrb.mxu0 %v1079_v60 }
 0x22d   :  { %1584 = vrot.lane.b32.xlu1 %v1583_v61, %s1638_s2  ;;  %1193 = vmatpush.msrb.mxu0 %v1078_v37  ;;  %v941_v37 = vld [vmem:[#allocation2 + $0x14] sm:$0x3f] }
 0x22e   :  { %998 = vrot.lane.b32.xlu2 %v950_v63, %s1638_s2 }
 0x22f   :  { %1194 = vmatpush.msrb.mxu0 %v1077_v43  ;;  %v946_v43 = vld [vmem:[#allocation2 + $0xe] sm:$0xff] }
 0x231   :  { %1195 = vmatpush.msrb.mxu0 %v1076_v53 }
 0x233   :  { %1196 = vmatpush.msrb.mxu0 %v1075_v21 }
 0x235   :  { %1197 = vmatpush.msrb.mxu0 %v1074_v45  ;;  %v947_v45 = vld [vmem:[#allocation2 + $0x16] sm:$0x3f] }
 0x237   :  { %1198 = vmatpush.msrb.mxu0 %v2852_v28 }
 0x267   :  { %v1540_v14 = vpop.permute.xlu2 %1539 }
 0x268   :  { %v1541_v42 = vunpack.i.l.bf16 %v1540_v14  ;;  %v1542_v47 = vunpack.i.h.bf16 %v1540_v14  ;;  %v951_v14 = vld [vmem:[#allocation2 + $0x10] sm:$0xff] }
 0x26a   :  { %v1011_v13 = vsel %vm32_vm1, %v927_v24, %v1541_v42 }
 0x26b   :  { %1121 = vmatmul.f32.vlgmr.msra.gmra.mxu2 %v1011_v13 }
 0x270   :  { %v1555_v59 = vpop.permute.xlu2 %1554 }
 0x271   :  { %v1556_v17 = vunpack.i.l.bf16 %v1555_v59  ;;  %v1557_v63 = vunpack.i.h.bf16 %v1555_v59  ;;  %v940_v59 = vld [vmem:[#allocation2 + $0xc] sm:$0xff] }
 0x273   :  { %v1012_v41 = vsel %vm32_vm1, %v928_v15, %v1556_v17  ;;  %v952_v17 = vld [vmem:[#allocation2 + $0x18] sm:$0x3f] }
 0x274   :  { %1124 = vmatmul.f32.gmra.mxu2 %v1012_v41 }
 0x278   :  { %v1565_v49 = vpop.permute.xlu2 %1564 }
 0x279   :  { %v1567_v8 = vunpack.i.h.bf16 %v1565_v49  ;;  %v1566_v44 = vunpack.i.l.bf16 %v1565_v49 }
 0x27b   :  { %v1015_v10 = vsel %vm32_vm1, %v934_v46, %v1567_v8 }
 0x280   :  { %v1545_v18 = vpop.permute.xlu0 %1544  ;;  %v1575_v62 = vpop.permute.xlu2 %1574 }
 0x281   :  { %v1546_v19 = vunpack.i.l.bf16 %v1545_v18  ;;  %v1547_v16 = vunpack.i.h.bf16 %v1545_v18  ;;  %v1577_v33 = vunpack.i.h.bf16 %v1575_v62 }
 0x283   :  { %v787_v34 = vsel %vm38_vm14, %v736_v30, %v1546_v19  ;;  %v788_v61 = vsel %vm38_vm14, %v737_v11, %v1547_v16 }
 0x284   :  { %v790_v39 = vsel %vm32_vm1, %v787_v34, %v1542_v47  ;;  %v791_v40 = vsel %vm32_vm1, %v788_v61, %v1557_v63  ;;  %v1591_v47 = vld [vmem:[%s2817_s7] ss:$0 sm:$0xff] }
 0x287   :  { %v1550_v58 = vpop.permute.xlu1 %1549  ;;  %v869_v28 = vpop.f32.mrf.mxu1 }
 0x288   :  { %v1560_v54 = vpop.permute.xlu0 %1559  ;;  %v1551_v29 = vunpack.i.l.bf16 %v1550_v58  ;;  %v1552_v50 = vunpack.i.h.bf16 %v1550_v58  ;;  %v999_v18 = vpop.permute.xlu2 %998 }
 0x289   :  { %v1562_v26 = vunpack.i.h.bf16 %v1560_v54  ;;  %v1561_v6 = vunpack.i.l.bf16 %v1560_v54  ;;  %v1022_v19 = vsel %vm32_vm1, %v947_v45, %v999_v18 }
 0x28a   :  { %v794_v1 = vsel %vm793_vm4, %v790_v39, %v1551_v29  ;;  %v795_v38 = vsel %vm793_vm4, %v791_v40, %v1552_v50 }
 0x28b   :  { %v1013_v3 = vsel %vm32_vm1, %v929_v48, %v1561_v6  ;;  %v1014_v2 = vsel %vm32_vm1, %v933_v7, %v1562_v26  ;;  %842 = vmatmul.f32.vlgmr.msra.gmra.mxu0 %v794_v1  ;;  %v1592_v26 = vld [vmem:[%s2818_s8] ss:$0 sm:$0xff] }
 0x28c   :  { %1127 = vmatmul.f32.gmra.mxu2 %v1013_v3  ;;  %1147 = vmatmul.f32.vlgmr.msrb.gmra.mxu3 %v1014_v2 }
 0x28d   :  { %1403 = vmatpush.msra.mxu0 %v2563_v55  ;;  %v738_v55 = vld [vmem:[#allocation3 + $0x10] sm:$0xf] }
 0x28f   :  { %1404 = vmatpush.msra.mxu0 %v2568_v0  ;;  %v759_v12 = vpop.permute.xlu1 %758  ;;  %v872_v34 = vpop.f32.mrf.mxu1 }
 0x290   :  { %v783_v5 = vpop.permute.xlu0 %782  ;;  %v789_v0 = vsel %vm38_vm14, %v738_v55, %v759_v12 }
 0x291   :  { %1405 = vmatpush.msra.mxu0 %v2574_v51  ;;  %v1576_v51 = vunpack.i.l.bf16 %v1575_v62  ;;  %v792_v56 = vsel %vm32_vm1, %v789_v0, %v1566_v44 }
 0x292   :  { %v796_v4 = vsel %vm793_vm4, %v792_v56, %v783_v5 }
 0x293   :  { %1406 = vmatpush.msra.mxu0 %v2580_v22  ;;  %v935_v22 = vld [vmem:[#allocation2 + $0x12] sm:$0x3f]  ;;  %v1023_v24 = vsel %vm32_vm1, %v951_v14, %v1576_v51 }
 0x294   :  { %845 = vmatmul.f32.gmra.mxu0 %v795_v38  ;;  %1225 = vmatmul.f32.vlgmr.msrb.gmra.mxu2 %v1012_v41  ;;  %v1016_v57 = vsel %vm32_vm1, %v935_v22, %v1577_v33 }
 0x295   :  { %1150 = vmatmul.f32.gmra.mxu3 %v1015_v10 }
 0x297   :  { %v1570_v20 = vpop.permute.xlu1 %1569  ;;  %v875_v7 = vpop.f32.mrf.mxu1 }
 0x298   :  { %v1571_v23 = vunpack.i.l.bf16 %v1570_v20  ;;  %v1580_v42 = vpop.permute.xlu0 %1579  ;;  %v1572_v13 = vunpack.i.h.bf16 %v1570_v20 }
 0x299   :  { %v1581_v31 = vunpack.i.l.bf16 %v1580_v42  ;;  %v1582_v35 = vunpack.i.h.bf16 %v1580_v42 }
 0x29a   :  { %v1017_v27 = vsel %vm32_vm1, %v939_v32, %v1571_v23  ;;  %v1020_v15 = vsel %vm32_vm1, %v945_v9, %v1572_v13 }
 0x29b   :  { %1173 = vmatmul.f32.vlgmr.msrb.gmra.mxu1 %v1017_v27  ;;  %v1018_v25 = vsel %vm32_vm1, %v940_v59, %v1581_v31  ;;  %v1021_v21 = vsel %vm32_vm1, %v946_v43, %v1582_v35  ;;  %v1593_v27 = vld [vmem:[%s2814_s4] ss:$0 sm:$0xff] }
 0x29c   :  { %848 = vmatmul.f32.gmra.mxu0 %v796_v4  ;;  %1228 = vmatmul.f32.gmra.mxu2 %v1023_v24  ;;  %v1594_v24 = vld [vmem:[%s2815_s5] ss:$0 sm:$0xff] }
 0x29d   :  { %1153 = vmatmul.f32.gmra.mxu3 %v1016_v57 }
 0x29f   :  { %v1585_v36 = vpop.permute.xlu1 %1584 }
 0x2a0   :  { %v1586_v52 = vunpack.i.l.bf16 %v1585_v36  ;;  %v1587_v60 = vunpack.i.h.bf16 %v1585_v36 }
 0x2a2   :  { %v1024_v41 = vsel %vm32_vm1, %v952_v17, %v1586_v52  ;;  %v1019_v53 = vsel %vm32_vm1, %v941_v37, %v1587_v60 }
 0x2a3   :  { %1176 = vmatmul.f32.gmra.mxu1 %v1018_v25 }
 0x2a4   :  { %1199 = vmatmul.f32.vlgmr.msrb.gmra.mxu0 %v1020_v15  ;;  %1231 = vmatmul.f32.gmra.mxu2 %v1024_v41 }
 0x2ab   :  { %1179 = vmatmul.f32.gmra.mxu1 %v1019_v53 }
 0x2ac   :  { %1202 = vmatmul.f32.gmra.mxu0 %v1021_v21 }
 0x2b4   :  { %1205 = vmatmul.f32.gmra.mxu0 %v1022_v19 }
 0x2ee   :  { %v1122_v30 = vpop.f32.mrf.mxu2 }
 0x2f7   :  { %v1125_v29 = vpop.f32.mrf.mxu2 }
 0x308   :  { %v843_v54 = vpop.f32.mrf.mxu0 }
 0x309   :  { %v870_v58 = vadd.f32 %v869_v28, %v843_v54 }
 0x30b   :  { %v882_v6 = vmul.f32 %v1591_v47, %v870_v58 }
 0x30d   :  { %v889_v39 = vadd.f32 %v1592_v26, %v882_v6 }
 0x30f   :  { %v895_v48 = vmin.f32 %v889_v39, 0.0  ;;  %v1128_v2 = vpop.f32.mrf.mxu2  ;;  %v1148_v50 = vpop.f32.mrf.mxu3  ;;  %vm892_vm5 = vcmp.gt.f32.partialorder %v889_v39, 0.0 }
 0x310   :  { %v1149_v10 = vadd.f32 %v1148_v50, %v1122_v30 }
 0x311   :  { %v846_v49 = vpop.f32.mrf.mxu0  ;;  %v898_v16 = vmul.f32 1.442695, %v895_v48 }
 0x312   :  { %v873_v1 = vadd.f32 %v872_v34, %v846_v49 }
 0x313   :  { %1619 = vpow2.f32 %v898_v16 }
 0x314   :  { %v883_v3 = vmul.f32 %v1591_v47, %v873_v1 }
 0x316   :  { %v890_v11 = vadd.f32 %v1592_v26, %v883_v3 }
 0x317   :  { %v1226_v44 = vpop.f32.mrf.mxu2 }
 0x318   :  { %v896_v61 = vmin.f32 %v890_v11, 0.0  ;;  %v1174_v8 = vpop.f32.mrf.mxu1  ;;  %v1151_v56 = vpop.f32.mrf.mxu3  ;;  %vm893_vm6 = vcmp.gt.f32.partialorder %v890_v11, 0.0 }
 0x319   :  { %v849_v63 = vpop.f32.mrf.mxu0  ;;  %v1620_v12 = vpop.eup %1619  ;;  %v1175_v20 = vadd.f32 %v1174_v8, %v1149_v10  ;;  %v1152_v13 = vadd.f32 %v1151_v56, %v1125_v29 }
 0x31a   :  { %v900_v5 = vmul.f32 1.442695, %v896_v61  ;;  %v876_v40 = vadd.f32 %v875_v7, %v849_v63  ;;  %v1485_v38 = vadd.f32 -1.0, %v1620_v12 }
 0x31c   :  { %1621 = vpow2.f32 %v900_v5  ;;  %v884_v46 = vmul.f32 %v1591_v47, %v876_v40  ;;  %v907_v55 = vmul.f32 1.6732632, %v1485_v38 }
 0x31e   :  { %v891_v62 = vadd.f32 %v1592_v26, %v884_v46  ;;  %v910_v0 = vsel %vm892_vm5, %v889_v39, %v907_v55 }
 0x31f   :  { %v913_v33 = vmul.f32 1.050701, %v910_v0  ;;  %v1229_v25 = vpop.f32.mrf.mxu2 }
 0x320   :  { %v897_v51 = vmin.f32 %v891_v62, 0.0  ;;  %v1177_v42 = vpop.f32.mrf.mxu1  ;;  %v1154_v43 = vpop.f32.mrf.mxu3  ;;  %vm894_vm7 = vcmp.gt.f32.partialorder %v891_v62, 0.0 }
 0x321   :  { %v1200_v23 = vpop.f32.mrf.mxu0  ;;  %916 = vst.msk [vmem:[%s2819_s9] sm:$0xff] %vm38_vm14, %v913_v33  ;;  %v1178_v9 = vadd.f32 %v1177_v42, %v1152_v13  ;;  %v1155_v19 = vadd.f32 %v1154_v43, %v1128_v2 }
 0x322   :  { %v1622_v32 = vpop.eup %1621  ;;  %v902_v4 = vmul.f32 1.442695, %v897_v51  ;;  %v1201_v22 = vadd.f32 %v1200_v23, %v1175_v20 }
 0x323   :  { %v1486_v14 = vadd.f32 -1.0, %v1622_v32 }
 0x324   :  { %1623 = vpow2.f32 %v902_v4  ;;  %v1227_v57 = vadd.f32 %v1226_v44, %v1201_v22 }
 0x325   :  { %v908_v31 = vmul.f32 1.6732632, %v1486_v14 }
 0x326   :  { %v1239_v36 = vmul.f32 %v1593_v27, %v1227_v57 }
 0x327   :  { %v911_v52 = vsel %vm893_vm6, %v890_v11, %v908_v31  ;;  %v1232_v29 = vpop.f32.mrf.mxu2 }
 0x328   :  { %v914_v59 = vmul.f32 1.050701, %v911_v52  ;;  %v1246_v17 = vadd.f32 %v1594_v24, %v1239_v36  ;;  %v1180_v45 = vpop.f32.mrf.mxu1 }
 0x329   :  { %v1203_v15 = vpop.f32.mrf.mxu0  ;;  %v1181_v47 = vadd.f32 %v1180_v45, %v1155_v19  ;;  %v1595_v19 = vld [vmem:[%s2817_s7] ss:$0 sm:$0xff] }
 0x32a   :  { %v1624_v41 = vpop.eup %1623  ;;  %917 = vst.msk [vmem:[%s2819_s9 + $0x8] sm:$0xff] %vm38_vm14, %v914_v59  ;;  %v1252_v35 = vmin.f32 %v1246_v17, 0.0  ;;  %v1204_v60 = vadd.f32 %v1203_v15, %v1178_v9  ;;  %vm1249_vm9 = vcmp.gt.f32.partialorder %v1246_v17, 0.0 }
 0x32b   :  { %v1487_v37 = vadd.f32 -1.0, %v1624_v41 }
 0x32c   :  { %v1255_v53 = vmul.f32 1.442695, %v1252_v35  ;;  %v1230_v21 = vadd.f32 %v1229_v25, %v1204_v60 }
 0x32d   :  { %v909_v18 = vmul.f32 1.6732632, %v1487_v37 }
 0x32e   :  { %1625 = vpow2.f32 %v1255_v53  ;;  %v1240_v28 = vmul.f32 %v1593_v27, %v1230_v21 }
 0x32f   :  { %v912_v30 = vsel %vm894_vm7, %v891_v62, %v909_v18 }
 0x330   :  { %v915_v34 = vmul.f32 1.050701, %v912_v30  ;;  %v1247_v54 = vadd.f32 %v1594_v24, %v1240_v28 }
 0x331   :  { %v1206_v58 = vpop.f32.mrf.mxu0 }
 0x332   :  { %919 = vst.msk [vmem:[%s2819_s9 + $0x10] sm:$0xf] %vm918_vm8, %v915_v34  ;;  %v1253_v26 = vmin.f32 %v1247_v54, 0.0  ;;  %v1207_v6 = vadd.f32 %v1206_v58, %v1181_v47  ;;  %vm1250_vm10 = vcmp.gt.f32.partialorder %v1247_v54, 0.0  ;;  %v1596_v47 = vld [vmem:[%s2818_s8] ss:$0 sm:$0xff] }
 0x334   :  { %v1626_v39 = vpop.eup %1625  ;;  %v1257_v48 = vmul.f32 1.442695, %v1253_v26  ;;  %v1233_v7 = vadd.f32 %v1232_v29, %v1207_v6 }
 0x335   :  { %v1488_v49 = vadd.f32 -1.0, %v1626_v39 }
 0x336   :  { %1627 = vpow2.f32 %v1257_v48  ;;  %v1241_v16 = vmul.f32 %v1593_v27, %v1233_v7 }
 0x337   :  { %v1264_v1 = vmul.f32 1.6732632, %v1488_v49 }
 0x338   :  { %v1248_v3 = vadd.f32 %v1594_v24, %v1241_v16 }
 0x339   :  { %v1267_v2 = vsel %vm1249_vm9, %v1246_v17, %v1264_v1 }
 0x33a   :  { %v1270_v11 = vmul.f32 1.050701, %v1267_v2  ;;  %v1254_v50 = vmin.f32 %v1248_v3, 0.0  ;;  %vm1251_vm11 = vcmp.gt.f32.partialorder %v1248_v3, 0.0 }
 0x33c   :  { %v1628_v61 = vpop.eup %1627  ;;  %1273 = vst.msk [vmem:[#allocation3 + $0x1] sm:$0xff] %vm38_vm14, %v1270_v11  ;;  %v1259_v63 = vmul.f32 1.442695, %v1254_v50 }
 0x33d   :  { %v1489_v8 = vadd.f32 -1.0, %v1628_v61 }
 0x33e   :  { %1629 = vpow2.f32 %v1259_v63 }
 0x33f   :  { %v1265_v12 = vmul.f32 1.6732632, %v1489_v8 }
 0x341   :  { %v1268_v5 = vsel %vm1250_vm10, %v1247_v54, %v1265_v12 }
 0x342   :  { %v1271_v40 = vmul.f32 1.050701, %v1268_v5 }
 0x343   :  { %v1279_v38 = vld [vmem:[#allocation3 + $0x1] sm:$0xff] }
 0x344   :  { %v1630_v46 = vpop.eup %1629  ;;  %1274 = vst.msk [vmem:[#allocation3 + $0x9] sm:$0xff] %vm38_vm14, %v1271_v40  ;;  %1294 = vrot.lane.b32.xlu0 %v1279_v38, %s1639_s16  ;;  %v1276_v24 = vld [vmem:[#allocation3] sm:$0xff] }
 0x345   :  { %v1490_v55 = vadd.f32 -1.0, %v1630_v46 }
 0x347   :  { %v1266_v10 = vmul.f32 1.6732632, %v1490_v55 }
 0x349   :  { %v1269_v62 = vsel %vm1251_vm11, %v1248_v3, %v1266_v10 }
 0x34a   :  { %v1272_v0 = vmul.f32 1.050701, %v1269_v62 }
 0x34b   :  { %v1288_v44 = vld [vmem:[#allocation3 + $0x4] sm:$0xff] }
 0x34c   :  { %v1285_v33 = vld [vmem:[#allocation3 + $0x3] sm:$0xff]  ;;  %1275 = vst.msk [vmem:[#allocation3 + $0x11] sm:$0x3f] %vm734_vm3, %v1272_v0  ;;  %1491 = vmatmul.msk.f32.vlgmr.msra.gmra.mxu0 %vm38_vm14, %v1288_v44 }
 0x34d   :  { %v1282_v51 = vld [vmem:[#allocation3 + $0x2] sm:$0xff]  ;;  %1318 = vrot.lane.b32.xlu2 %v1285_v33, %s1640_s20 }
 0x34e   :  { %v1280_v20 = vld [vmem:[#allocation3 + $0x9] sm:$0xff]  ;;  %1306 = vrot.lane.b32.xlu1 %v1282_v51, %s1638_s2 }
 0x34f   :  { %1296 = vrot.lane.b32.xlu0 %v1280_v20, %s1639_s16  ;;  %v1277_v17 = vld [vmem:[#allocation3 + $0x8] sm:$0xff] }
 0x353   :  { %v1289_v56 = vld [vmem:[#allocation3 + $0xc] sm:$0xff]  ;;  %v1290_v22 = vld [vmem:[#allocation3 + $0x14] sm:$0xf] }
 0x354   :  { %v1286_v23 = vld [vmem:[#allocation3 + $0xb] sm:$0xff]  ;;  %1492 = vmatmul.msk.f32.vlgmr.msra.gmra.mxu1 %vm38_vm14, %v1289_v56  ;;  %v1287_v27 = vld [vmem:[#allocation3 + $0x13] sm:$0xf] }
 0x355   :  { %v1283_v32 = vld [vmem:[#allocation3 + $0xa] sm:$0xff]  ;;  %1320 = vrot.lane.b32.xlu2 %v1286_v23, %s1640_s20  ;;  %v1284_v14 = vld [vmem:[#allocation3 + $0x12] sm:$0xf] }
 0x356   :  { %v1281_v4 = vld [vmem:[#allocation3 + $0x11] sm:$0xf]  ;;  %1308 = vrot.lane.b32.xlu1 %v1283_v32, %s1638_s2 }
 0x357   :  { %1298 = vrot.lane.b32.xlu0 %v1281_v4, %s1639_s16  ;;  %v1278_v37 = vld [vmem:[#allocation3 + $0x10] sm:$0xf] }
 0x35c   :  { %1493 = vmatmul.msk.f32.gmra.mxu1 %vm38_vm14, %v1290_v22 }
 0x35d   :  { %1322 = vrot.lane.b32.xlu2 %v1287_v27, %s1640_s20 }
 0x35e   :  { %1310 = vrot.lane.b32.xlu1 %v1284_v14, %s1638_s2 }
 0x3a7   :  { %v1319_v57 = vpop.permute.xlu2 %1318 }
 0x3af   :  { %v1321_v9 = vpop.permute.xlu2 %1320 }
 0x3b6   :  { %v1295_v42 = vpop.permute.xlu0 %1294 }
 0x3b7   :  { %v1327_v31 = vsel %vm38_vm14, %v1276_v24, %v1295_v42  ;;  %v1323_v21 = vpop.permute.xlu2 %1322 }
 0x3c0   :  { %v1307_v13 = vpop.permute.xlu1 %1306 }
 0x3c1   :  { %v1330_v36 = vsel %vm32_vm1, %v1327_v31, %v1307_v13  ;;  %v1297_v59 = vpop.permute.xlu0 %1296 }
 0x3c2   :  { %v1333_v52 = vsel %vm793_vm4, %v1330_v36, %v1319_v57  ;;  %v1328_v25 = vsel %vm38_vm14, %v1277_v17, %v1297_v59 }
 0x3c3   :  { %1381 = vmatmul.f32.vlgmr.msra.gmra.mxu3 %v1333_v52 }
 0x3c8   :  { %v1309_v15 = vpop.permute.xlu1 %1308 }
 0x3c9   :  { %v1331_v41 = vsel %vm32_vm1, %v1328_v25, %v1309_v15  ;;  %v1299_v60 = vpop.permute.xlu0 %1298  ;;  %v1408_v28 = vpop.f32.mrf.mxu0 }
 0x3ca   :  { %v1334_v35 = vsel %vm793_vm4, %v1331_v41, %v1321_v9  ;;  %v1329_v43 = vsel %vm38_vm14, %v1278_v37, %v1299_v60 }
 0x3cb   :  { %1384 = vmatmul.f32.gmra.mxu3 %v1334_v35 }
 0x3d0   :  { %v1311_v53 = vpop.permute.xlu1 %1310 }
 0x3d1   :  { %v1332_v18 = vsel %vm32_vm1, %v1329_v43, %v1311_v53  ;;  %v1411_v26 = vpop.f32.mrf.mxu1 }
 0x3d2   :  { %v1335_v45 = vsel %vm793_vm4, %v1332_v18, %v1323_v21 }
 0x3d3   :  { %1387 = vmatmul.f32.gmra.mxu3 %v1335_v45 }
 0x3d9   :  { %v1414_v1 = vpop.f32.mrf.mxu1 }
 0x446   :  { %v1382_v30 = vpop.f32.mrf.mxu3 }
 0x447   :  { %v1409_v34 = vadd.f32 %v1408_v28, %v1382_v30 }
 0x449   :  { %v1421_v54 = vmul.f32 %v1595_v19, %v1409_v34 }
 0x44b   :  { %v1428_v58 = vadd.f32 %v1596_v47, %v1421_v54 }
 0x44d   :  { %v1434_v6 = vmin.f32 %v1428_v58, 0.0  ;;  %vm1431_vm1 = vcmp.gt.f32.partialorder %v1428_v58, 0.0 }
 0x44e   :  { %v1385_v29 = vpop.f32.mrf.mxu3 }
 0x44f   :  { %v1437_v39 = vmul.f32 1.442695, %v1434_v6  ;;  %v1412_v48 = vadd.f32 %v1411_v26, %v1385_v29 }
 0x451   :  { %1631 = vpow2.f32 %v1437_v39  ;;  %v1422_v7 = vmul.f32 %v1595_v19, %v1412_v48 }
 0x453   :  { %v1429_v49 = vadd.f32 %v1596_v47, %v1422_v7 }
 0x455   :  { %v1435_v16 = vmin.f32 %v1429_v49, 0.0  ;;  %vm1432_vm12 = vcmp.gt.f32.partialorder %v1429_v49, 0.0 }
 0x456   :  { %v1388_v3 = vpop.f32.mrf.mxu3 }
 0x457   :  { %v1632_v2 = vpop.eup %1631  ;;  %v1439_v11 = vmul.f32 1.442695, %v1435_v16  ;;  %v1415_v50 = vadd.f32 %v1414_v1, %v1388_v3 }
 0x458   :  { %v1494_v61 = vadd.f32 -1.0, %v1632_v2 }
 0x459   :  { %1633 = vpow2.f32 %v1439_v11  ;;  %v1423_v63 = vmul.f32 %v1595_v19, %v1415_v50 }
 0x45a   :  { %v1446_v8 = vmul.f32 1.6732632, %v1494_v61 }
 0x45b   :  { %v1430_v12 = vadd.f32 %v1596_v47, %v1423_v63 }
 0x45c   :  { %v1449_v5 = vsel %vm1431_vm1, %v1428_v58, %v1446_v8 }
 0x45d   :  { %v1452_v40 = vmul.f32 1.050701, %v1449_v5  ;;  %v1436_v38 = vmin.f32 %v1430_v12, 0.0  ;;  %vm1433_vm13 = vcmp.gt.f32.partialorder %v1430_v12, 0.0 }
 0x45f   :  { %v1634_v46 = vpop.eup %1633  ;;  %1497 = vst.msk [vmem:[%s2819_s9 + $0x18] sm:$0xff] %vm38_vm14, %v1452_v40  ;;  %v1441_v55 = vmul.f32 1.442695, %v1436_v38 }
 0x460   :  { %v1495_v10 = vadd.f32 -1.0, %v1634_v46 }
 0x461   :  { %1635 = vpow2.f32 %v1441_v55 }
 0x462   :  { %v1447_v62 = vmul.f32 1.6732632, %v1495_v10 }
 0x464   :  { %v1450_v0 = vsel %vm1432_vm12, %v1429_v49, %v1447_v62 }
 0x465   :  { %v1453_v44 = vmul.f32 1.050701, %v1450_v0 }
 0x467   :  { %v1636_v33 = vpop.eup %1635  ;;  %1498 = vst.msk [vmem:[%s2819_s9 + $0x20] sm:$0xff] %vm38_vm14, %v1453_v44 }
 0x468   :  { %v1496_v51 = vadd.f32 -1.0, %v1636_v33 }
 0x46a   :  { %v1448_v20 = vmul.f32 1.6732632, %v1496_v51 }
 0x46c   :  { %v1451_v56 = vsel %vm1433_vm13, %v1430_v12, %v1448_v20 }
 0x46d   :  { %v1454_v23 = vmul.f32 1.050701, %v1451_v56 }
 0x46f   :  { %1499 = vst.msk [vmem:[%s2819_s9 + $0x28] sm:$0xf] %vm918_vm8, %v1454_v23 }

</bundles_post_ra>
